<compile_context>
chip_gen: v7x
topology: tpu7x:2x2x1
jax: 0.10.0
libtpu: 0.0.40
codegen_flags: <defaults>
</compile_context>

<pallas_src>
import functools

import numpy as np

import jax
import jax.numpy as jnp
from jax.experimental import pallas as pl
from jax.experimental.pallas import tpu as pltpu

_MB = 1024 * 1024


def _round_up(x, m):
    return -(-x // m) * m


def _pick_hw_tiling(hw, batch, max_tile=4096, overhead_px=1024):
    """Pick (hw_tile, hw_pad): hw_tile is a multiple of 256 (128 for tiny maps),
    hw_pad = n_tiles * hw_tile >= hw.  Scoring trades padding waste against the
    ~0.35us fixed per-grid-step overhead (expressed in 'pixels')."""
    hw128 = _round_up(hw, 128)
    cap = min(max_tile, hw128)
    if batch == 1 and hw128 >= 256:
        # Guarantee >= 2 grid steps so both v7x TensorCores get work.
        cap = min(cap, _round_up(hw128 // 2, 128))
    cands = list(range(256, cap + 1, 256)) or [cap]
    best = None
    for t in cands:
        padded = _round_up(hw, t)
        score = padded + (padded // t) * overhead_px
        if best is None or score < best[0] or (score == best[0] and t > best[1]):
            best = (score, t, padded)
    return best[1], best[2]


# ----------------------------------------------------------------------------
# Fused conv1x1 + decode + relayout kernel
# ----------------------------------------------------------------------------
def _yolo_head_kernel(x_ref, shift_ref, w_ref, b_ref, cid_ref,
                      onew_ref, oref_ref, *, n_a, n_ch, stride):
    # x_ref    : (C, hw_tile)   bf16 feature tile (channels-first, HW on lanes)
    # shift_ref: (2, hw_tile)   f32  [x-index ; y-index] per flattened position
    # w_ref    : (D, C)         bf16 fused 1x1-conv weights (resident)
    # b_ref    : (D, 1)         f32  fused bias (guide + ln(anchor) folded in)
    # cid_ref  : (D, 1)         f32  per-row channel id  (row % n_ch)
    # onew_ref : (hw_tile, D)           -> (B, HW, n_a*n_ch)   [pred_new view]
    # oref_ref : (n_a, hw_tile, n_ch)   -> (B, n_a, HW, n_ch)  [refined view]
    raw = jnp.dot(w_ref[...], x_ref[...],
                  preferred_element_type=jnp.float32) + b_ref[...]

    cid = cid_ref[...]                                   # (D, 1)
    sig = jax.nn.sigmoid(raw)                            # EUP, whole tile
    ex = jnp.exp(raw)                                    # EUP, whole tile

    xs = shift_ref[0:1, :]                               # (1, hw_tile)
    ys = shift_ref[1:2, :]
    # grid shift only on channels 0 (x) / 1 (y); 0 elsewhere
    shift = jnp.where(cid == 0.0, xs, jnp.where(cid == 1.0, ys, 0.0))

    # ch 0,1: (sigmoid + grid) * stride
    # ch 2,3: exp(logit)  (guide_wh + ln(anchor) already folded into logit)
    # ch 4+ : sigmoid (objectness + classes)
    dec = jnp.where(cid < 2.0, (sig + shift) * stride,
                    jnp.where(cid < 4.0, ex, sig))       # (D, hw_tile)

    # In-VMEM relayout to the two consumer-final layouts (XLU transposes):
    for a in range(n_a):
        blk = jnp.transpose(dec[a * n_ch:(a + 1) * n_ch, :])   # (hw_tile, n_ch)
        oref_ref[a, :, :] = blk
        onew_ref[:, a * n_ch:(a + 1) * n_ch] = blk


@functools.partial(
    jax.jit,
    static_argnames=("n_anchors", "n_classes", "stride", "max_hw_tile"))
def yolo_head_forward(xin, w_fused, b_fused, *, n_anchors, n_classes, stride,
                      max_hw_tile=4096):
    """xin: (B, C, H, W) NCHW.  Returns (refined_pred, pred_new)."""
    B, C, H, W = xin.shape
    n_a = n_anchors
    n_ch = 5 + n_classes
    D = n_a * n_ch
    HW = H * W
    hw_tile, hw_pad = _pick_hw_tiling(HW, B, max_hw_tile)
    n_tiles = hw_pad // hw_tile

    # NCHW -> (B, C, HW) is a free reshape; bf16 halves the dominant input
    # stream (MXU takes bf16 natively, decode runs on the f32 accumulators).
    x3 = xin.reshape(B, C, HW).astype(jnp.bfloat16)
    # Per-position grid shifts (row-major flattening: x = p % W, y = p // W),
    # precomputed so the kernel needs no integer div/mod.
    xs = jnp.tile(jnp.arange(W, dtype=jnp.float32), H)
    ys = jnp.repeat(jnp.arange(H, dtype=jnp.float32), W)
    shift = jnp.stack([xs, ys], axis=0)                      # (2, HW)
    if hw_pad != HW:
        x3 = jnp.pad(x3, ((0, 0), (0, 0), (0, hw_pad - HW)))
        shift = jnp.pad(shift, ((0, 0), (0, hw_pad - HW)))
    cid = (jnp.arange(D, dtype=jnp.float32) % n_ch).reshape(D, 1)
    b2 = b_fused.reshape(D, 1).astype(jnp.float32)

    kernel = functools.partial(_yolo_head_kernel, n_a=n_a, n_ch=n_ch,
                               stride=float(stride))

    # VMEM budget from the actual (lane/sublane padded) double-buffered tiles.
    lane = 128
    est = 2 * (C * hw_tile * 2                                  # x tile (bf16)
               + 8 * hw_tile * 4                                # shift tile
               + hw_tile * _round_up(D, lane) * 4               # out_new tile
               + n_a * hw_tile * _round_up(n_ch, lane) * 4      # out_refined tile
               + _round_up(D, 8) * _round_up(C, lane) * 2       # weights
               + 2 * _round_up(D, 8) * lane * 4)                # bias + cid
    vmem_limit = int(min(48 * _MB, max(32 * _MB, est + 4 * _MB)))

    out_new, out_refined = pl.pallas_call(
        kernel,
        out_shape=(
            jax.ShapeDtypeStruct((B, hw_pad, D), jnp.float32),
            jax.ShapeDtypeStruct((B, n_a, hw_pad, n_ch), jnp.float32),
        ),
        grid=(B, n_tiles),
        in_specs=[
            # streamed feature tile (double-buffered by the pipeline)
            pl.BlockSpec((None, C, hw_tile), lambda b, t: (b, 0, t)),
            # streamed grid-shift rows
            pl.BlockSpec((2, hw_tile), lambda b, t: (0, t)),
            # resident fused weights / bias / channel-id (constant index_map)
            pl.BlockSpec((D, C), lambda b, t: (0, 0)),
            pl.BlockSpec((D, 1), lambda b, t: (0, 0)),
            pl.BlockSpec((D, 1), lambda b, t: (0, 0)),
        ],
        out_specs=(
            pl.BlockSpec((None, hw_tile, D), lambda b, t: (b, t, 0)),
            pl.BlockSpec((None, n_a, hw_tile, n_ch), lambda b, t: (b, 0, t, 0)),
        ),
        compiler_params=pltpu.CompilerParams(
            dimension_semantics=("parallel", "parallel"),
            vmem_limit_bytes=vmem_limit),
    )(x3, shift, w_fused, b2, cid)

    # Both views are free reshapes (plus an identity-or-cheap slice if HW was
    # padded); no full-slab transposes remain in the wrapper.
    pred_new = out_new[:, :HW, :].reshape(B, HW, n_a, n_ch)
    refined_pred = out_refined[:, :, :HW, :].reshape(B, n_a * HW, n_ch)
    return refined_pred, pred_new


# ----------------------------------------------------------------------------
# Module wrapper
# ----------------------------------------------------------------------------
class YOLOv3HeadPallas:
    def __init__(self, anch_mask, n_classes, stride, in_ch=64, sep=True,
                 key=jax.random.PRNGKey(0)):
        anchors = [(10, 13), (16, 30), (33, 23), (30, 61), (62, 45),
                   (42, 119), (116, 90), (156, 198), (121, 240)]
        if sep:
            anchors = [(10, 13), (16, 30), (33, 23), (30, 61), (62, 45),
                       (42, 119), (116, 90), (156, 198), (373, 326)]
        self.anch_mask = anch_mask
        self.n_anchors = 4
        self.n_classes = n_classes
        self.stride = stride
        self.in_ch = in_ch
        self.masked_anchors = [anchors[i] for i in anch_mask]
        assert len(self.masked_anchors) == self.n_anchors - 1

        n_a = self.n_anchors
        n_ch = 5 + n_classes
        D = n_a * n_ch
        k1, k2, k3, k4 = jax.random.split(key, 4)
        scale = 0.05
        # Unfused 1x1-conv parameters, stored (out_ch, in_ch) == w[:, :, 0, 0];
        # kept in f32 for the faithful reference.
        self.w_guide = scale * jax.random.normal(k1, (2 * n_a, in_ch), jnp.float32)
        self.b_guide = scale * jax.random.normal(k2, (2 * n_a,), jnp.float32)
        self.w_conv = scale * jax.random.normal(k3, (D, in_ch), jnp.float32)
        self.b_conv = scale * jax.random.normal(k4, (D,), jnp.float32)

        # Algebraic fold (exact for linear ops):
        #   exp(t_wh)*exp(guide_wh)*anchor
        #     == exp((W_wh + W_guide) @ x + (b_wh + b_guide) + ln(anchor))
        # -> guide rows fold into the conv's wh rows, anchors fold into the
        #    wh biases.  D stays n_a*n_ch; no guide add / anchor mul in-kernel.
        anchor_w = [float(w) for (w, _h) in self.masked_anchors] + [float(stride * 4)]
        anchor_h = [float(h) for (_w, h) in self.masked_anchors] + [float(stride * 4)]
        wf = np.array(self.w_conv, dtype=np.float32)
        bf = np.array(self.b_conv, dtype=np.float32)
        wg = np.array(self.w_guide, dtype=np.float32)
        bg = np.array(self.b_guide, dtype=np.float32)
        for a in range(n_a):
            wf[a * n_ch + 2] += wg[2 * a]
            wf[a * n_ch + 3] += wg[2 * a + 1]
            bf[a * n_ch + 2] += bg[2 * a] + np.log(anchor_w[a])
            bf[a * n_ch + 3] += bg[2 * a + 1] + np.log(anchor_h[a])
        # bf16 weights: kernel is HBM-bound, MXU takes bf16 natively.
        self.w_fused = jnp.asarray(wf, dtype=jnp.bfloat16)
        self.b_fused = jnp.asarray(bf, dtype=jnp.float32)
        assert self.w_fused.shape == (D, in_ch)
        assert self.b_fused.shape == (D,)

    def forward(self, xin):
        """xin: (B, C, H, W) float32 (NCHW, like PyTorch)."""
        return yolo_head_forward(
            xin, self.w_fused, self.b_fused,
            n_anchors=self.n_anchors, n_classes=self.n_classes,
            stride=self.stride)


# ----------------------------------------------------------------------------
# Pure-JAX reference (mirrors the PyTorch forward semantics, NCHW, full f32)
# ----------------------------------------------------------------------------
def reference_forward(head, xin):
    B, C, H, W = xin.shape
    n_a = head.n_anchors
    n_ch = 5 + head.n_classes

    x2d = jnp.transpose(xin, (0, 2, 3, 1)).reshape(-1, C)
    wh_flat = x2d @ head.w_guide.T + head.b_guide
    out_flat = x2d @ head.w_conv.T + head.b_conv
    wh_pred = jnp.transpose(wh_flat.reshape(B, H, W, 2 * n_a), (0, 3, 1, 2))
    output = jnp.transpose(out_flat.reshape(B, H, W, n_a * n_ch), (0, 3, 1, 2))

    wh_pred = jnp.exp(wh_pred)
    wh_pred = jnp.transpose(wh_pred.reshape(B, n_a, 2, H, W), (0, 1, 3, 4, 2))
    output = jnp.transpose(output.reshape(B, n_a, n_ch, H, W), (0, 1, 3, 4, 2))

    x_shift = jnp.broadcast_to(jnp.arange(W, dtype=jnp.float32), (B, n_a, H, W))
    y_shift = jnp.broadcast_to(
        jnp.arange(H, dtype=jnp.float32).reshape(H, 1), (B, n_a, H, W))

    masked = jnp.array(head.masked_anchors, dtype=jnp.float32)
    w_anch = masked[:, 0].reshape(1, n_a - 1, 1, 1)
    h_anch = masked[:, 1].reshape(1, n_a - 1, 1, 1)
    pa_w = jnp.concatenate(
        [wh_pred[:, : n_a - 1, :, :, 0] * w_anch,
         wh_pred[:, n_a - 1:, :, :, 0] * (head.stride * 4)], axis=1)
    pa_h = jnp.concatenate(
        [wh_pred[:, : n_a - 1, :, :, 1] * h_anch,
         wh_pred[:, n_a - 1:, :, :, 1] * (head.stride * 4)], axis=1)

    sig = jax.nn.sigmoid(output)
    px = (sig[..., 0] + x_shift) * head.stride
    py = (sig[..., 1] + y_shift) * head.stride
    pw = jnp.exp(output[..., 2]) * pa_w
    ph = jnp.exp(output[..., 3]) * pa_h
    rest = sig[..., 4:]
    pred = jnp.concatenate(
        [px[..., None], py[..., None], pw[..., None], ph[..., None], rest],
        axis=-1)
    refined = pred.reshape(B, -1, n_ch)
    pred_new = jnp.transpose(pred.reshape(B, n_a, H * W, n_ch), (0, 2, 1, 3))
    return refined, pred_new


# ----------------------------------------------------------------------------
if __name__ == "__main__":
    key = jax.random.PRNGKey(0)
    k_param, k_x1, k_x2 = jax.random.split(key, 3)

    B, in_ch, n_classes, stride = 2, 64, 3, 8
    anch_mask = [6, 7, 8]
    head = YOLOv3HeadPallas(anch_mask, n_classes, stride, in_ch=in_ch,
                            sep=True, key=k_param)
    n_ch = 5 + n_classes

    # (16, 16): 128-divisible spatial size (no-padding path)
    # (13, 13): real-world odd feature map exercising the HW-pad + slice path
    for k_x, (H, W) in ((k_x1, (16, 16)), (k_x2, (13, 13))):
        x = jax.random.normal(k_x, (B, in_ch, H, W), jnp.float32)

        refined_pred, pred_new = head.forward(x)
        refined_pred = jax.block_until_ready(refined_pred)
        pred_new = jax.block_until_ready(pred_new)

        ref_refined, ref_new = reference_forward(head, x)

        assert refined_pred.shape == (B, head.n_anchors * H * W, n_ch)
        assert pred_new.shape == (B, H * W, head.n_anchors, n_ch)
        # Tolerance: the kernel feeds the MXU bf16 inputs (f32 accumulation)
        # while the reference is full f32, giving O(1e-3) relative differences.
        # Layout / indexing bugs produce O(1)+ errors, so this does not mask them.
        assert jnp.allclose(refined_pred, ref_refined, rtol=1e-2, atol=1e-2), (
            "refined_pred mismatch, max abs err:",
            float(jnp.max(jnp.abs(refined_pred - ref_refined))))
        assert jnp.allclose(pred_new, ref_new, rtol=1e-2, atol=1e-2), (
            "pred_new mismatch, max abs err:",
            float(jnp.max(jnp.abs(pred_new - ref_new))))

    print("KERNEL_OK")
</pallas_src>

<mosaic_0001>
module attributes {stable_mosaic.version = 11 : i64} {
  func.func @_yolo_head_kernel(%arg0: i32, %arg1: i32, %arg2: memref<1x64x256xbf16, #tpu.memory_space<vmem>>, %arg3: memref<2x256xf32, #tpu.memory_space<vmem>>, %arg4: memref<32x64xbf16, #tpu.memory_space<vmem>>, %arg5: memref<32x1xf32, #tpu.memory_space<vmem>>, %arg6: memref<32x1xf32, #tpu.memory_space<vmem>>, %arg7: memref<1x256x32xf32, #tpu.memory_space<vmem>>, %arg8: memref<1x4x256x8xf32, #tpu.memory_space<vmem>>) attributes {dimension_semantics = [#tpu.dimension_semantics<parallel>, #tpu.dimension_semantics<parallel>], iteration_bounds = array<i64: 2, 1>, scalar_prefetch = 0 : i64, scratch_operands = 0 : i64, tpu.core_type = #tpu.core_type<tc>, window_params = [{transform_indices = @transform_0, window_bounds = array<i64: 1, 64, 256>}, {transform_indices = @transform_1, window_bounds = array<i64: 2, 256>}, {pipeline_mode = #tpu.pipeline_mode<synchronous>, transform_indices = @transform_2, window_bounds = array<i64: 32, 64>}, {pipeline_mode = #tpu.pipeline_mode<synchronous>, transform_indices = @transform_3, window_bounds = array<i64: 32, 1>}, {pipeline_mode = #tpu.pipeline_mode<synchronous>, transform_indices = @transform_4, window_bounds = array<i64: 32, 1>}, {transform_indices = @transform_5, window_bounds = array<i64: 1, 256, 32>}, {transform_indices = @transform_6, window_bounds = array<i64: 1, 4, 256, 8>}]} {
    %c0 = arith.constant 0 : index
    %c0_0 = arith.constant 0 : index
    %0 = vector.load %arg4[%c0, %c0_0] : memref<32x64xbf16, #tpu.memory_space<vmem>>, vector<32x64xbf16>
    %c0_1 = arith.constant 0 : index
    %c0_2 = arith.constant 0 : index
    %c0_3 = arith.constant 0 : index
    %1 = vector.load %arg2[%c0_1, %c0_2, %c0_3] : memref<1x64x256xbf16, #tpu.memory_space<vmem>>, vector<1x64x256xbf16>
    %2 = vector.shape_cast %1 : vector<1x64x256xbf16> to vector<64x256xbf16>
    %cst = arith.constant dense<0.000000e+00> : vector<32x256xf32>
    %3 = tpu.matmul %0, %2, %cst {dimension_numbers = #tpu.dot_dimension_numbers<[1], [0], [0], [1], [0, 0, 1, 1], [], []>} : vector<32x64xbf16>, vector<64x256xbf16>, vector<32x256xf32> -> vector<32x256xf32>
    %c0_4 = arith.constant 0 : index
    %c0_5 = arith.constant 0 : index
    %4 = vector.load %arg5[%c0_4, %c0_5] : memref<32x1xf32, #tpu.memory_space<vmem>>, vector<32x1xf32>
    %5 = vector.broadcast %4 : vector<32x1xf32> to vector<32x256xf32>
    %6 = arith.addf %3, %5 : vector<32x256xf32>
    %c0_6 = arith.constant 0 : index
    %c0_7 = arith.constant 0 : index
    %7 = vector.load %arg6[%c0_6, %c0_7] : memref<32x1xf32, #tpu.memory_space<vmem>>, vector<32x1xf32>
    %8 = arith.negf %6 : vector<32x256xf32>
    %9 = math.exp %8 : vector<32x256xf32>
    %cst_8 = arith.constant 1.000000e+00 : f32
    %10 = vector.broadcast %cst_8 : f32 to vector<32x256xf32>
    %11 = arith.addf %10, %9 : vector<32x256xf32>
    %12 = arith.divf %10, %11 : vector<32x256xf32>
    %13 = math.exp %6 : vector<32x256xf32>
    %c0_9 = arith.constant 0 : index
    %c0_10 = arith.constant 0 : index
    %14 = vector.load %arg3[%c0_9, %c0_10] : memref<2x256xf32, #tpu.memory_space<vmem>>, vector<1x256xf32>
    %c1 = arith.constant 1 : index
    %c0_11 = arith.constant 0 : index
    %15 = vector.load %arg3[%c1, %c0_11] : memref<2x256xf32, #tpu.memory_space<vmem>>, vector<1x256xf32>
    %cst_12 = arith.constant 0.000000e+00 : f32
    %16 = vector.broadcast %cst_12 : f32 to vector<32x1xf32>
    %17 = arith.cmpf oeq, %7, %16 : vector<32x1xf32>
    %cst_13 = arith.constant 1.000000e+00 : f32
    %18 = vector.broadcast %cst_13 : f32 to vector<32x1xf32>
    %19 = arith.cmpf oeq, %7, %18 : vector<32x1xf32>
    %cst_14 = arith.constant 0.000000e+00 : f32
    %20 = vector.shape_cast %19 : vector<32x1xi1> to vector<32x1xi1>
    %21 = vector.broadcast %20 : vector<32x1xi1> to vector<32x256xi1>
    %22 = vector.shape_cast %15 : vector<1x256xf32> to vector<1x256xf32>
    %23 = vector.broadcast %22 : vector<1x256xf32> to vector<32x256xf32>
    %24 = vector.broadcast %cst_14 : f32 to vector<32x256xf32>
    %25 = arith.select %21, %23, %24 : vector<32x256xi1>, vector<32x256xf32>
    %26 = vector.shape_cast %17 : vector<32x1xi1> to vector<32x1xi1>
    %27 = vector.broadcast %26 : vector<32x1xi1> to vector<32x256xi1>
    %28 = vector.shape_cast %14 : vector<1x256xf32> to vector<1x256xf32>
    %29 = vector.broadcast %28 : vector<1x256xf32> to vector<32x256xf32>
    %30 = arith.select %27, %29, %25 : vector<32x256xi1>, vector<32x256xf32>
    %cst_15 = arith.constant 2.000000e+00 : f32
    %31 = vector.broadcast %cst_15 : f32 to vector<32x1xf32>
    %32 = arith.cmpf olt, %7, %31 : vector<32x1xf32>
    %33 = arith.addf %12, %30 : vector<32x256xf32>
    %cst_16 = arith.constant 8.000000e+00 : f32
    %34 = vector.broadcast %cst_16 : f32 to vector<32x256xf32>
    %35 = arith.mulf %33, %34 : vector<32x256xf32>
    %cst_17 = arith.constant 4.000000e+00 : f32
    %36 = vector.broadcast %cst_17 : f32 to vector<32x1xf32>
    %37 = arith.cmpf olt, %7, %36 : vector<32x1xf32>
    %38 = vector.shape_cast %37 : vector<32x1xi1> to vector<32x1xi1>
    %39 = vector.broadcast %38 : vector<32x1xi1> to vector<32x256xi1>
    %40 = arith.select %39, %13, %12 : vector<32x256xi1>, vector<32x256xf32>
    %41 = vector.shape_cast %32 : vector<32x1xi1> to vector<32x1xi1>
    %42 = vector.broadcast %41 : vector<32x1xi1> to vector<32x256xi1>
    %43 = arith.select %42, %35, %40 : vector<32x256xi1>, vector<32x256xf32>
    %44 = vector.extract_strided_slice %43 {offsets = [0, 0], sizes = [8, 256], strides = [1, 1]} : vector<32x256xf32> to vector<8x256xf32>
    %45 = tpu.transpose %44, [1, 0] : vector<8x256xf32> -> vector<256x8xf32>
    %c0_18 = arith.constant 0 : index
    %c0_19 = arith.constant 0 : index
    %c0_20 = arith.constant 0 : index
    %c0_21 = arith.constant 0 : index
    %46 = vector.load %arg8[%c0_18, %c0_19, %c0_20, %c0_21] : memref<1x4x256x8xf32, #tpu.memory_space<vmem>>, vector<1x1x256x8xf32>
    %47 = vector.shape_cast %46 : vector<1x1x256x8xf32> to vector<256x8xf32>
    %48 = vector.shape_cast %45 : vector<256x8xf32> to vector<1x1x256x8xf32>
    tpu.vector_store %arg8[%c0_18, %c0_19, %c0_20, %c0_21], %48 {strides = array<i32>} : memref<1x4x256x8xf32, #tpu.memory_space<vmem>>, vector<1x1x256x8xf32>,
    %c0_22 = arith.constant 0 : index
    %c0_23 = arith.constant 0 : index
    %c0_24 = arith.constant 0 : index
    %49 = vector.load %arg7[%c0_22, %c0_23, %c0_24] : memref<1x256x32xf32, #tpu.memory_space<vmem>>, vector<1x256x8xf32>
    %50 = vector.shape_cast %49 : vector<1x256x8xf32> to vector<256x8xf32>
    %51 = vector.shape_cast %45 : vector<256x8xf32> to vector<1x256x8xf32>
    tpu.vector_store %arg7[%c0_22, %c0_23, %c0_24], %51 {strides = array<i32>} : memref<1x256x32xf32, #tpu.memory_space<vmem>>, vector<1x256x8xf32>,
    %52 = vector.extract_strided_slice %43 {offsets = [8, 0], sizes = [8, 256], strides = [1, 1]} : vector<32x256xf32> to vector<8x256xf32>
    %53 = tpu.transpose %52, [1, 0] : vector<8x256xf32> -> vector<256x8xf32>
    %c0_25 = arith.constant 0 : index
    %c1_26 = arith.constant 1 : index
    %c0_27 = arith.constant 0 : index
    %c0_28 = arith.constant 0 : index
    %54 = vector.load %arg8[%c0_25, %c1_26, %c0_27, %c0_28] : memref<1x4x256x8xf32, #tpu.memory_space<vmem>>, vector<1x1x256x8xf32>
    %55 = vector.shape_cast %54 : vector<1x1x256x8xf32> to vector<256x8xf32>
    %56 = vector.shape_cast %53 : vector<256x8xf32> to vector<1x1x256x8xf32>
    tpu.vector_store %arg8[%c0_25, %c1_26, %c0_27, %c0_28], %56 {strides = array<i32>} : memref<1x4x256x8xf32, #tpu.memory_space<vmem>>, vector<1x1x256x8xf32>,
    %c0_29 = arith.constant 0 : index
    %c0_30 = arith.constant 0 : index
    %c8 = arith.constant 8 : index
    %57 = vector.load %arg7[%c0_29, %c0_30, %c8] : memref<1x256x32xf32, #tpu.memory_space<vmem>>, vector<1x256x8xf32>
    %58 = vector.shape_cast %57 : vector<1x256x8xf32> to vector<256x8xf32>
    %59 = vector.shape_cast %53 : vector<256x8xf32> to vector<1x256x8xf32>
    tpu.vector_store %arg7[%c0_29, %c0_30, %c8], %59 {strides = array<i32>} : memref<1x256x32xf32, #tpu.memory_space<vmem>>, vector<1x256x8xf32>,
    %60 = vector.extract_strided_slice %43 {offsets = [16, 0], sizes = [8, 256], strides = [1, 1]} : vector<32x256xf32> to vector<8x256xf32>
    %61 = tpu.transpose %60, [1, 0] : vector<8x256xf32> -> vector<256x8xf32>
    %c0_31 = arith.constant 0 : index
    %c2 = arith.constant 2 : index
    %c0_32 = arith.constant 0 : index
    %c0_33 = arith.constant 0 : index
    %62 = vector.load %arg8[%c0_31, %c2, %c0_32, %c0_33] : memref<1x4x256x8xf32, #tpu.memory_space<vmem>>, vector<1x1x256x8xf32>
    %63 = vector.shape_cast %62 : vector<1x1x256x8xf32> to vector<256x8xf32>
    %64 = vector.shape_cast %61 : vector<256x8xf32> to vector<1x1x256x8xf32>
    tpu.vector_store %arg8[%c0_31, %c2, %c0_32, %c0_33], %64 {strides = array<i32>} : memref<1x4x256x8xf32, #tpu.memory_space<vmem>>, vector<1x1x256x8xf32>,
    %c0_34 = arith.constant 0 : index
    %c0_35 = arith.constant 0 : index
    %c16 = arith.constant 16 : index
    %65 = vector.load %arg7[%c0_34, %c0_35, %c16] : memref<1x256x32xf32, #tpu.memory_space<vmem>>, vector<1x256x8xf32>
    %66 = vector.shape_cast %65 : vector<1x256x8xf32> to vector<256x8xf32>
    %67 = vector.shape_cast %61 : vector<256x8xf32> to vector<1x256x8xf32>
    tpu.vector_store %arg7[%c0_34, %c0_35, %c16], %67 {strides = array<i32>} : memref<1x256x32xf32, #tpu.memory_space<vmem>>, vector<1x256x8xf32>,
    %68 = vector.extract_strided_slice %43 {offsets = [24, 0], sizes = [8, 256], strides = [1, 1]} : vector<32x256xf32> to vector<8x256xf32>
    %69 = tpu.transpose %68, [1, 0] : vector<8x256xf32> -> vector<256x8xf32>
    %c0_36 = arith.constant 0 : index
    %c3 = arith.constant 3 : index
    %c0_37 = arith.constant 0 : index
    %c0_38 = arith.constant 0 : index
    %70 = vector.load %arg8[%c0_36, %c3, %c0_37, %c0_38] : memref<1x4x256x8xf32, #tpu.memory_space<vmem>>, vector<1x1x256x8xf32>
    %71 = vector.shape_cast %70 : vector<1x1x256x8xf32> to vector<256x8xf32>
    %72 = vector.shape_cast %69 : vector<256x8xf32> to vector<1x1x256x8xf32>
    tpu.vector_store %arg8[%c0_36, %c3, %c0_37, %c0_38], %72 {strides = array<i32>} : memref<1x4x256x8xf32, #tpu.memory_space<vmem>>, vector<1x1x256x8xf32>,
    %c0_39 = arith.constant 0 : index
    %c0_40 = arith.constant 0 : index
    %c24 = arith.constant 24 : index
    %73 = vector.load %arg7[%c0_39, %c0_40, %c24] : memref<1x256x32xf32, #tpu.memory_space<vmem>>, vector<1x256x8xf32>
    %74 = vector.shape_cast %73 : vector<1x256x8xf32> to vector<256x8xf32>
    %75 = vector.shape_cast %69 : vector<256x8xf32> to vector<1x256x8xf32>
    tpu.vector_store %arg7[%c0_39, %c0_40, %c24], %75 {strides = array<i32>} : memref<1x256x32xf32, #tpu.memory_space<vmem>>, vector<1x256x8xf32>,
    return
  }
  func.func @transform_0(%arg0: i32, %arg1: i32) -> (i32, i32, i32) {
    %c0_i32 = arith.constant 0 : i32
    %c0_i32_0 = arith.constant 0 : i32
    return %arg0, %c0_i32, %arg1 : i32, i32, i32
  }
  func.func @transform_1(%arg0: i32, %arg1: i32) -> (i32, i32) {
    %c0_i32 = arith.constant 0 : i32
    %c0_i32_0 = arith.constant 0 : i32
    return %c0_i32, %arg1 : i32, i32
  }
  func.func @transform_2(%arg0: i32, %arg1: i32) -> (i32, i32) {
    %c0_i32 = arith.constant 0 : i32
    %c0_i32_0 = arith.constant 0 : i32
    %c0_i32_1 = arith.constant 0 : i32
    return %c0_i32, %c0_i32_0 : i32, i32
  }
  func.func @transform_3(%arg0: i32, %arg1: i32) -> (i32, i32) {
    %c0_i32 = arith.constant 0 : i32
    %c0_i32_0 = arith.constant 0 : i32
    %c0_i32_1 = arith.constant 0 : i32
    return %c0_i32, %c0_i32_0 : i32, i32
  }
  func.func @transform_4(%arg0: i32, %arg1: i32) -> (i32, i32) {
    %c0_i32 = arith.constant 0 : i32
    %c0_i32_0 = arith.constant 0 : i32
    %c0_i32_1 = arith.constant 0 : i32
    return %c0_i32, %c0_i32_0 : i32, i32
  }
  func.func @transform_5(%arg0: i32, %arg1: i32) -> (i32, i32, i32) {
    %c0_i32 = arith.constant 0 : i32
    %c0_i32_0 = arith.constant 0 : i32
    return %arg0, %arg1, %c0_i32 : i32, i32, i32
  }
  func.func @transform_6(%arg0: i32, %arg1: i32) -> (i32, i32, i32, i32) {
    %c0_i32 = arith.constant 0 : i32
    %c0_i32_0 = arith.constant 0 : i32
    %c0_i32_1 = arith.constant 0 : i32
    return %arg0, %c0_i32, %arg1, %c0_i32_0 : i32, i32, i32, i32
  }
}

</mosaic_0001>

<bundles_post_ra>
// kernel: tile.9
= control target key start
LH: loop header
LB: loop body
LE: loop exit
PB: predicated region body
PF: predicated region fallthrough
CT: control target
= control target key end

     0   :  { %s7_s6 = smov 3  ;;  %s21_s9 = smov 3  ;;  %vm4_vm0 = vcmask 130048   ;;  %vm11_vm1 = vcmask 1048448   ;;  %vm18_vm2 = vcmask 917248   ;;  %vm25_vm3 = vcmask 786048   ;;  %s128_s0 = inlined_call_operand.vmem [shape: f32[16,16], index: 0, kind: input, shape index: {}]   ;;  %s129_s1 = inlined_call_operand.vmem [shape: f32[1,256], index: 1, kind: output, shape index: {}]  }
   0x1   :  { %v66_v0 = vld [vmem:[%s128_s0 + $0x7] ss:$8 sm:%s7_s6]   ;;  %s81_s10 = smov 112   ;;  %v68_v1 = vld [vmem:[%s128_s0 + $0x5] ss:$8 sm:%s21_s9]   ;;  %s14_s13 = smov 3 }
   0x2   :  { %9 = vrot.lane.b32.xlu0 %v66_v0, %s81_s10  ;;  %s82_s14 = smov 80   ;;  %v67_v2 = vld [vmem:[%s128_s0 + $0x6] ss:$8 sm:%s14_s13]   ;;  %s28_s17 = smov 3  ;;  %vm32_vm4 = vcmask 654848   ;;  %vm39_vm5 = vcmask 523648  }
   0x3   :  { %23 = vrot.lane.b32.xlu1 %v68_v1, %s82_s14  ;;  %v69_v3 = vld [vmem:[%s128_s0 + $0x4] ss:$8 sm:%s28_s17]   ;;  %s35_s20 = smov 3  ;;  %s42_s21 = smov 3  ;;  %vm46_vm6 = vcmask 392448   ;;  %vm53_vm7 = vcmask 261248  }
   0x4   :  { %s83_s22 = smov 96   ;;  %s84_s23 = smov 64   ;;  %v70_v4 = vld [vmem:[%s128_s0 + $0x3] ss:$8 sm:%s35_s20]   ;;  %v71_v5 = vld [vmem:[%s128_s0 + $0x2] ss:$8 sm:%s42_s21]  }
   0x5   :  { %s2_s26 = smov 3  ;;  %s49_s29 = smov 3 }
   0x6   :  { %16 = vrot.lane.b32.xlu0 %v67_v2, %s83_s22  ;;  %v3_v6 = vld [vmem:[%s128_s0] ss:$8 sm:%s2_s26]   ;;  %s85_s3 = smov 48   ;;  %s86_s4 = smov 32  }
   0x7   :  { %30 = vrot.lane.b32.xlu1 %v69_v3, %s84_s23  ;;  %5 = vst.msk [vmem:[#allocation0] ss:$8 sm:$0x3] %vm4_vm0, %v3_v6   ;;  %v72_v7 = vld [vmem:[%s128_s0 + $0x1] ss:$8 sm:%s49_s29]   ;;  %s87_s0 = smov 16  }
   0xa   :  { %37 = vrot.lane.b32.xlu0 %v70_v4, %s85_s3 }
   0xb   :  { %44 = vrot.lane.b32.xlu1 %v71_v5, %s86_s4 }
   0xe   :  { %51 = vrot.lane.b32.xlu0 %v72_v7, %s87_s0 }
  0x74   :  { %v10_v8 = vpop.permute.xlu0 %9  }
  0x75   :  { %12 = vst.msk [vmem:[#allocation0] ss:$8 sm:$0x3] %vm11_vm1, %v10_v8   ;;  %v24_v9 = vpop.permute.xlu1 %23  }
  0x78   :  { %v17_v10 = vpop.permute.xlu0 %16  }
  0x79   :  { %19 = vst.msk [vmem:[#allocation0] ss:$8 sm:$0x3] %vm18_vm2, %v17_v10   ;;  %v31_v11 = vpop.permute.xlu1 %30  }
  0x7a   :  { %26 = vst.msk [vmem:[#allocation0] ss:$8 sm:$0x3] %vm25_vm3, %v24_v9  }
  0x7b   :  { %33 = vst.msk [vmem:[#allocation0] ss:$8 sm:$0x3] %vm32_vm4, %v31_v11  }
  0x7c   :  { %v38_v12 = vpop.permute.xlu0 %37  }
  0x7d   :  { %40 = vst.msk [vmem:[#allocation0] ss:$8 sm:$0x3] %vm39_vm5, %v38_v12   ;;  %v45_v13 = vpop.permute.xlu1 %44  }
  0x7e   :  { %47 = vst.msk [vmem:[#allocation0] ss:$8 sm:$0x3] %vm46_vm6, %v45_v13  }
  0x80   :  { %v52_v14 = vpop.permute.xlu0 %51  }
  0x81   :  { %54 = vst.msk [vmem:[#allocation0] ss:$8 sm:$0x3] %vm53_vm7, %v52_v14  }
  0x88   :  { %v58_v15 = vld [vmem:[#allocation0] sm:$0x1]  ;;  %v62_v16 = vld [vmem:[#allocation0 + $0x8] sm:$0x1] }
  0x89   :  { %60 = vst [vmem:[%s129_s1] sm:$0x1] %v58_v15  ;;  %73 = vst [vmem:[%s129_s1 + $0x1] sm:$0x1] %v62_v16 }

// kernel: yolo_head_forward.1
= control target key start
LH: loop header
LB: loop body
LE: loop exit
PB: predicated region body
PF: predicated region fallthrough
CT: control target
= control target key end

     0   :  { %s2074_s21 = smov 0   ;;  %s2076_s22 = smov 0   ;;  %s3181_s0 = inlined_call_operand.vmem [shape: bf16[2,64,256], index: 0, kind: input, shape index: {}]   ;;  %s3182_s1 = inlined_call_operand.vmem [shape: f32[2,256], index: 1, kind: input, shape index: {}]   ;;  %s3183_s2 = inlined_call_operand.vmem [shape: bf16[32,64], index: 2, kind: input, shape index: {}]   ;;  %s3184_s3 = inlined_call_operand.vmem [shape: f32[32,1], index: 3, kind: input, shape index: {}]   ;;  %s3185_s4 = inlined_call_operand.vmem [shape: f32[32,1], index: 4, kind: input, shape index: {}]   ;;  %s3186_s5 = inlined_call_operand.vmem [shape: f32[2,256,32], index: 5, kind: output, shape index: {0}]   ;;  %s3187_s6 = inlined_call_operand.vmem [shape: f32[2,4,256,8], index: 6, kind: output, shape index: {1}]  }
   0x1   :  { %s2078_s23 = smov 0  }
   0x2 LB: > { %s29_s24 = sadd.s32 1, %s2029_s22  ;;  %p1781_p0 = scmp.ge.s32.totalorder %s2033_s23, 1  ;;  %s2033_s23 = sphi %s2078_s23, %s17_s23   ;;  %s2029_s22 = sphi %s2076_s22, %s3189_s22   ;;  %s2025_s21 = sphi %s2074_s21, %s3188_s21  }
   0x3   : > { %p31_p1 = scmp.ge.s32.totalorder %s29_s24, 2  ;;  %p249_p2 = scmp.lt.s32.totalorder %s2033_s23, 3 }
   0x5   : > { %s3191_s24 = smov (%p31_p1, %s29_s24), 0  ;;  %p250_p3 = pnand %p1781_p0, %p249_p2 }
   0x6   : > { %p302_p4 = scmp.lt.s32.totalorder (!%p250_p3), %s2025_s21, 1  ;;  %v2035_v0 = vmov (!%p250_p3), 0   ;;  %v350_v1 = vld [vmem:[%s3184_s3] sm:$0xff] (!%p250_p3)  ;;  %v352_v3 = vld [vmem:[%s3184_s3 + $0x10] sm:$0xff] (!%p250_p3)  ;;  %v351_v4 = vld [vmem:[%s3184_s3 + $0x8] sm:$0xff] (!%p250_p3)  ;;  %vm424_vm7 = vcmask (!%p250_p3), 523264   ;;  %v584_v37 = vlaneseq (!%p250_p3) }
   0x7   : > { %253 = sbr.rel (%p250_p3) target bundleno = 868 (0x364), region = 40  ;;  %463 = vmatprep.mubr.bf16.mxu0 (!%p250_p3), %v2035_v0  ;;  %473 = vmatprep.mubr.bf16.mxu1 (!%p250_p3), %v2035_v0  ;;  %v2104_v2 = vld [vmem:[%s3185_s4] sm:$0xff] (!%p250_p3)  ;;  %v2122_v5 = vld [vmem:[%s3185_s4 + $0x10] sm:$0xff] (!%p250_p3)  ;;  %v2127_v6 = vld [vmem:[%s3185_s4 + $0x8] sm:$0xff] (!%p250_p3)  ;;  %s2037_s17 = smov (!%p250_p3), 16  }
   0x8   : > { %1947 = vset.pattern.permute.xlu0 (!%p250_p3), %v2035_v0  ;;  %1948 = vset.pattern.permute.xlu1 (!%p250_p3), %v2035_v0  ;;  %vm559_vm0 = vcmp.eq.f32.partialorder (!%p250_p3), %v2104_v2, 1.0  ;;  %v353_v11 = vld [vmem:[%s3184_s3 + $0x18] sm:$0xff] (!%p250_p3)  ;;  %vm561_vm1 = vcmp.eq.f32.partialorder (!%p250_p3), %v2122_v5, 1.0  ;;  %vm560_vm2 = vcmp.eq.f32.partialorder (!%p250_p3), %v2127_v6, 1.0  ;;  %vm555_vm3 = vcmp.eq.f32.partialorder (!%p250_p3), %v2104_v2, 0.0  ;;  %v1961_v22 = vld [vmem:[%s3183_s2] sm:$0xff] (!%p250_p3)  }
   0x9   : > { %356 = vperm.xlu0 (!%p250_p3), %1947, %v350_v1   ;;  %366 = vperm.xlu1 (!%p250_p3), %1948, %v352_v3   ;;  %v563_v10 = vsel (!%p250_p3), %vm559_vm0, 1, %v2035_v0  ;;  %v2141_v13 = vld [vmem:[%s3185_s4 + $0x18] sm:$0xff] (!%p250_p3)  ;;  %v565_v15 = vsel (!%p250_p3), %vm561_vm1, 1, %v2035_v0  ;;  %v564_v16 = vsel (!%p250_p3), %vm560_vm2, 1, %v2035_v0  ;;  %v602_v19 = vsel (!%p250_p3), %vm555_vm3, 1, %v2035_v0  ;;  %v1962_v23 = vld [vmem:[%s3183_s2 + $0x8] sm:$0xff] (!%p250_p3)  }
   0xa   : > { %vm562_vm4 = vcmp.eq.f32.partialorder (!%p250_p3), %v2141_v13, 1.0  ;;  %vm557_vm5 = vcmp.eq.f32.partialorder (!%p250_p3), %v2122_v5, 0.0  ;;  %vm556_vm6 = vcmp.eq.f32.partialorder (!%p250_p3), %v2127_v6, 0.0  ;;  %vm661_vm8 = vcmp.lt.f32.partialorder (!%p250_p3), %v2104_v2, 4.0  ;;  %s2038_s18 = smov (!%p250_p3), 24  }
   0xb   : > { %v566_v20 = vsel (!%p250_p3), %vm562_vm4, 1, %v2035_v0  ;;  %v604_v24 = vsel (!%p250_p3), %vm557_vm5, 1, %v2035_v0  ;;  %v603_v25 = vsel (!%p250_p3), %vm556_vm6, 1, %v2035_v0  ;;  %vm558_vm9 = vcmp.eq.f32.partialorder (!%p250_p3), %v2141_v13, 0.0 }
   0xc   : > { %v665_v26 = vsel (!%p250_p3), %vm661_vm8, 1, %v2035_v0  ;;  %v605_v27 = vsel (!%p250_p3), %vm558_vm9, 1, %v2035_v0  ;;  %vm663_vm10 = vcmp.lt.f32.partialorder (!%p250_p3), %v2122_v5, 4.0  ;;  %vm662_vm11 = vcmp.lt.f32.partialorder (!%p250_p3), %v2127_v6, 4.0 }
   0xd   : > { %361 = vperm.xlu0 (!%p250_p3), %1947, %v351_v4   ;;  %371 = vperm.xlu1 (!%p250_p3), %1948, %v353_v11   ;;  %v667_v28 = vsel (!%p250_p3), %vm663_vm10, 1, %v2035_v0  ;;  %v666_v29 = vsel (!%p250_p3), %vm662_vm11, 1, %v2035_v0  ;;  %vm641_vm12 = vcmp.lt.f32.partialorder (!%p250_p3), %v2104_v2, 2.0  ;;  %vm664_vm13 = vcmp.lt.f32.partialorder (!%p250_p3), %v2141_v13, 4.0 }
   0xe   : > { %s3193_s21 = smov (!%p302_p4, %s2025_s21), 1  ;;  %v693_v30 = vsel %vm641_vm12, 1, %v2035_v0  ;;  %v668_v31 = vsel %vm664_vm13, 1, %v2035_v0  ;;  %vm643_vm14 = vcmp.lt.f32.partialorder %v2122_v5, 2.0  ;;  %vm642_vm15 = vcmp.lt.f32.partialorder %v2127_v6, 2.0 }
   0xf   : > { %s1907_s7 = sshll.u32 %s3193_s21, 6  ;;  %v695_v32 = vsel %vm643_vm14, 1, %v2035_v0  ;;  %v694_v33 = vsel %vm642_vm15, 1, %v2035_v0  ;;  %vm644_vm0 = vcmp.lt.f32.partialorder %v2141_v13, 2.0  ;;  %v585_v39 = vshrl.u32 %v584_v37, 7  ;;  %s1908_s9 = sshll.u32 %s3193_s21, 8 }
  0x10   : > { %s2116_s12 = scalar_lea.vmem %s3181_s0, %s1907_s7  ;;  %v696_v34 = vsel %vm644_vm0, 1, %v2035_v0  ;;  %v1808_v44 = vld [vmem:[%s3182_s1 + $0x1] ss:$2 sm:$0x3]  ;;  %s1909_s10 = sshll.u32 %s3193_s21, 10 }
  0x11   : > { %v1949_v7 = vld [vmem:[%s2116_s12 + $0x4] ss:$8 sps:$4 sm:$0xff]   ;;  %v1951_v8 = vld [vmem:[%s2116_s12] ss:$8 sps:$4 sm:$0xff]   ;;  %v1952_v9 = vld [vmem:[%s2116_s12 + $0x14] ss:$8 sps:$4 sm:$0xff]   ;;  %568 = vperm.xlu0 %1947, %v563_v10   ;;  %571 = vperm.xlu1 %1948, %v564_v16   ;;  %s2291_s13 = scalar_lea.vmem %s3186_s5, %s1908_s9  ;;  %s2296_s16 = scalar_lea.vmem %s3187_s6, %s1909_s10 }
  0x12   : > { %431 = vmatprep.subr.bf16.mxu0 %v1949_v7  ;;  %1910 = vmatprep.subr.bf16.mxu1 %v1949_v7  ;;  %v1954_v12 = vld [vmem:[%s2116_s12 + $0x10] ss:$8 sps:$4 sm:$0xff]   ;;  %v1955_v14 = vld [vmem:[%s2116_s12 + $0x24] ss:$8 sps:$4 sm:$0xff]   ;;  %v1957_v17 = vld [vmem:[%s2116_s12 + $0x20] ss:$8 sps:$4 sm:$0xff]  }
  0x13   : > { %432 = vmatpush1.bf16.msra.mxu0 %v1951_v8  ;;  %1914 = vmatpush1.bf16.msra.mxu1 %v1951_v8  ;;  %v1958_v18 = vld [vmem:[%s2116_s12 + $0x34] ss:$8 sps:$4 sm:$0xff]   ;;  %v1960_v21 = vld [vmem:[%s2116_s12 + $0x30] ss:$8 sps:$4 sm:$0xff]   ;;  %v586_v42 = vsub.s32 0, %v585_v39  ;;  %v590_v43 = vsub.s32 1, %v585_v39 }
  0x14   : > { %433 = vmatprep.subr.bf16.mxu0 %v1952_v9  ;;  %1911 = vmatprep.subr.bf16.mxu1 %v1952_v9  ;;  %v552_v49 = vld [vmem:[%s3182_s1] ss:$2 sm:$0x3]  ;;  %s2036_s21 = smov 8  }
  0x15   : > { %574 = vperm.xlu0 %1947, %v565_v15   ;;  %577 = vperm.xlu1 %1948, %v566_v20   ;;  %v2189_v47 = vrot.slane %v1808_v44, %v586_v42  ;;  %v2191_v48 = vrot.slane %v1808_v44, %v590_v43  ;;  %v2198_v52 = vrot.slane %v552_v49, %v586_v42 }
  0x16   : > { %v2200_v53 = vrot.slane %v552_v49, %v590_v43 }
  0x17   : > { %434 = vmatpush1.bf16.msra.mxu0 %v1954_v12  ;;  %1915 = vmatpush1.bf16.msra.mxu1 %v1954_v12 }
  0x18   : > { %435 = vmatprep.subr.bf16.mxu0 %v1955_v14  ;;  %1912 = vmatprep.subr.bf16.mxu1 %v1955_v14 }
  0x19   : > { %607 = vperm.xlu0 %1947, %v602_v19   ;;  %610 = vperm.xlu1 %1948, %v603_v25  }
  0x1b   : > { %436 = vmatpush1.bf16.msra.mxu0 %v1957_v17  ;;  %1916 = vmatpush1.bf16.msra.mxu1 %v1957_v17 }
  0x1c   : > { %437 = vmatprep.subr.bf16.mxu0 %v1958_v18  ;;  %1913 = vmatprep.subr.bf16.mxu1 %v1958_v18 }
  0x1d   : > { %613 = vperm.xlu0 %1947, %v604_v24   ;;  %616 = vperm.xlu1 %1948, %v605_v27  }
  0x1f   : > { %438 = vmatpush1.bf16.msra.mxu0 %v1960_v21  ;;  %1917 = vmatpush1.bf16.msra.mxu1 %v1960_v21 }
  0x21   : > { %670 = vperm.xlu0 %1947, %v665_v26   ;;  %673 = vperm.xlu1 %1948, %v666_v29  }
  0x22   : > { %1798 = vmatmul.mubr.msk.bf16.vlgmr.msra.gmra.mrb[0].mxu0 %vm424_vm7, %v1961_v22  ;;  %1799 = vmatmul.mubr.msk.bf16.vlgmr.msra.gmra.mrb[0].mxu1 %vm424_vm7, %v1962_v23 }
  0x25   : > { %676 = vperm.xlu0 %1947, %v667_v28   ;;  %679 = vperm.xlu1 %1948, %v668_v31  }
  0x29   : > { %698 = vperm.xlu0 %1947, %v693_v30   ;;  %701 = vperm.xlu1 %1948, %v694_v33  }
  0x2d   : > { %704 = vperm.xlu0 %1947, %v695_v32   ;;  %707 = vperm.xlu1 %1948, %v696_v34  }
  0x88   : > { %v357_v35 = vpop.permute.xlu0 %356  ;;  %v367_v36 = vpop.permute.xlu1 %366 }
  0x8c   : > { %v362_v38 = vpop.permute.xlu0 %361  ;;  %v2184_v41 = vpop.permute.xlu1 %371 }
  0x90   : > { %v2182_v40 = vpop.permute.xlu0 %568  ;;  %v572_v46 = vpop.permute.xlu1 %571 }
  0x91   : > { %vm580_vm2 = vcmp.eq.s32.totalorder %v572_v46, 1  ;;  %vm579_vm7 = vcmp.eq.s32.totalorder %v2182_v40, 1 }
  0x92   : > { %v596_v58 = vsel %vm580_vm2, %v2189_v47, 0.0  ;;  %v597_v59 = vsel %vm580_vm2, %v2191_v48, 0.0  ;;  %vm1075_vm2 = vcmask 130112  }
  0x94   : > { %v575_v45 = vpop.permute.xlu0 %574  ;;  %v578_v51 = vpop.permute.xlu1 %577 }
  0x95   : > { %vm581_vm1 = vcmp.eq.s32.totalorder %v575_v45, 1  ;;  %vm582_vm3 = vcmp.eq.s32.totalorder %v578_v51, 1 }
  0x96   : > { %v600_v54 = vsel %vm582_vm3, %v2189_v47, 0.0  ;;  %v601_v55 = vsel %vm582_vm3, %v2191_v48, 0.0  ;;  %v598_v56 = vsel %vm581_vm1, %v2189_v47, 0.0  ;;  %v599_v57 = vsel %vm581_vm1, %v2191_v48, 0.0 }
  0x97   : > { %vm785_vm1 = vcmask 64512   ;;  %vm1333_vm3 = vcmask 195712  }
  0x98   : > { %v2196_v50 = vpop.permute.xlu0 %607  ;;  %v611_v61 = vpop.permute.xlu1 %610 }
  0x99   : > { %vm619_vm5 = vcmp.eq.s32.totalorder %v611_v61, 1  ;;  %vm618_vm8 = vcmp.eq.s32.totalorder %v2196_v50, 1  ;;  %v595_v61 = vsel %vm579_vm7, %v2191_v48, 0.0 }
  0x9a   : > { %v2215_v0 = vsel %vm619_vm5, %v2198_v52, %v596_v58  ;;  %v2218_v1 = vsel %vm619_vm5, %v2200_v53, %v597_v59  ;;  %v634_v40 = vsel %vm618_vm8, %v2200_v53, %v595_v61 }
  0x9c   : > { %v614_v60 = vpop.permute.xlu0 %613  ;;  %v617_v2 = vpop.permute.xlu1 %616 }
  0x9d   : > { %vm620_vm4 = vcmp.eq.s32.totalorder %v614_v60, 1  ;;  %vm621_vm6 = vcmp.eq.s32.totalorder %v617_v2, 1 }
  0x9e   : > { %v2209_v62 = vsel %vm620_vm4, %v2198_v52, %v598_v56  ;;  %v2212_v63 = vsel %vm620_vm4, %v2200_v53, %v599_v57  ;;  %v2221_v3 = vsel %vm621_vm6, %v2198_v52, %v600_v54  ;;  %v2224_v4 = vsel %vm621_vm6, %v2200_v53, %v601_v55 }
  0x9f   : > { %v594_v55 = vsel %vm579_vm7, %v2189_v47, 0.0  ;;  %vm1591_vm4 = vcmask 261312  }
  0xa0   : > { %v2227_v28 = vpop.permute.xlu0 %670  ;;  %v2233_v45 = vpop.permute.xlu1 %673  ;;  %v633_v47 = vsel %vm618_vm8, %v2198_v52, %v594_v55 }
  0xa1   : > { %vm681_vm9 = vcmp.eq.s32.totalorder %v2227_v28, 1  ;;  %vm682_vm13 = vcmp.eq.s32.totalorder %v2233_v45, 1 }
  0xf5   : > { %v465_v5 = vpop.f32.mrb[0].mxu0  ;;  %v475_v6 = vpop.f32.mrb[0].mxu1 }
  0xf6   : > { %v466_v7 = vadd.f32 %v465_v5, %v357_v35  ;;  %v476_v8 = vadd.f32 %v475_v6, %v367_v36  ;;  %v467_v9 = vpop.f32.mrb[1].mxu0  ;;  %v477_v10 = vpop.f32.mrb[1].mxu1 }
  0xf7   : > { %v468_v11 = vadd.f32 %v467_v9, %v357_v35  ;;  %v469_v12 = vpop.f32.mrb[2].mxu0  ;;  %v479_v13 = vpop.f32.mrb[2].mxu1  ;;  %v478_v16 = vadd.f32 %v477_v10, %v367_v36 }
  0xf8   : > { %v1800_v14 = vmul.f32 -1.442695, %v466_v7  ;;  %v1804_v15 = vmul.f32 -1.442695, %v476_v8  ;;  %v470_v18 = vadd.f32 %v469_v12, %v362_v38  ;;  %v471_v19 = vpop.f32.mrb[3].mxu0  ;;  %v481_v20 = vpop.f32.mrb[3].mxu1  ;;  %v480_v24 = vadd.f32 %v479_v13, %v2184_v41 }
  0xf9   : > { %v1801_v17 = vmul.f32 -1.442695, %v468_v11  ;;  %v1805_v21 = vmul.f32 -1.442695, %v478_v16  ;;  %v472_v22 = vadd.f32 %v471_v19, %v362_v38  ;;  %v536_v25 = vmul.f32 1.442695, %v466_v7  ;;  %v2230_v38 = vpop.permute.xlu0 %676  ;;  %v2245_v9 = vpop.permute.xlu1 %679 }
  0xfa   : > { %1963 = vpow2.f32 %v1800_v14  ;;  %v1802_v23 = vmul.f32 -1.442695, %v470_v18  ;;  %v544_v27 = vmul.f32 1.442695, %v476_v8  ;;  %v1806_v29 = vmul.f32 -1.442695, %v480_v24 }
  0xfb   : > { %1965 = vpow2.f32 %v1804_v15  ;;  %v1803_v26 = vmul.f32 -1.442695, %v472_v22  ;;  %v482_v30 = vadd.f32 %v481_v20, %v2184_v41  ;;  %v546_v32 = vmul.f32 1.442695, %v478_v16 }
  0xfc   : > { %1967 = vpow2.f32 %v1801_v17  ;;  %v538_v43 = vmul.f32 1.442695, %v468_v11  ;;  %v548_v46 = vmul.f32 1.442695, %v480_v24  ;;  %v540_v57 = vmul.f32 1.442695, %v470_v18 }
  0xfd   : > { %1969 = vpow2.f32 %v1805_v21  ;;  %v1807_v35 = vmul.f32 -1.442695, %v482_v30  ;;  %v699_v56 = vpop.permute.xlu0 %698  ;;  %v542_v2 = vmul.f32 1.442695, %v472_v22  ;;  %v550_v7 = vmul.f32 1.442695, %v482_v30 }
  0xfe   : > { %1971 = vpow2.f32 %v1802_v23  ;;  %vm683_vm10 = vcmp.eq.s32.totalorder %v2230_v38, 1  ;;  %vm709_vm11 = vcmp.eq.s32.totalorder %v699_v56, 1  ;;  %vm684_vm14 = vcmp.eq.s32.totalorder %v2245_v9, 1 }
  0xff   : > { %1973 = vpow2.f32 %v536_v25 }
 0x100   : > { %1975 = vpow2.f32 %v1803_v26 }
 0x101   : > { %1977 = vpow2.f32 %v544_v27  ;;  %v705_v52 = vpop.permute.xlu0 %704 }
 0x102   : > { %1979 = vpow2.f32 %v1806_v29  ;;  %vm711_vm12 = vcmp.eq.s32.totalorder %v705_v52, 1 }
 0x104   : > { %v1964_v31 = vpop.eup %1963 }
 0x105   : > { %v512_v33 = vadd.f32 1.0, %v1964_v31  ;;  %v1966_v34 = vpop.eup %1965 }
 0x106   : > { %v516_v36 = vadd.f32 1.0, %v1966_v34  ;;  %v1968_v37 = vpop.eup %1967 }
 0x107   : > { %1981 = vrcp.f32 %v512_v33  ;;  %v513_v39 = vadd.f32 1.0, %v1968_v37  ;;  %v1970_v42 = vpop.eup %1969 }
 0x108   : > { %1983 = vpow2.f32 %v546_v32  ;;  %v517_v41 = vadd.f32 1.0, %v1970_v42  ;;  %v1972_v44 = vpop.eup %1971 }
 0x109   : > { %1985 = vrcp.f32 %v516_v36  ;;  %v1974_v49 = vpop.eup %1973  ;;  %v514_v51 = vadd.f32 1.0, %v1972_v44 }
 0x10a   : > { %1987 = vpow2.f32 %v1807_v35  ;;  %v1976_v54 = vpop.eup %1975 }
 0x10b   : > { %1989 = vrcp.f32 %v513_v39  ;;  %v1978_v58 = vpop.eup %1977  ;;  %v515_v59 = vadd.f32 1.0, %v1976_v54 }
 0x10c   : > { %1991 = vrcp.f32 %v517_v41  ;;  %v1980_v60 = vpop.eup %1979 }
 0x10d   : > { %1993 = vpow2.f32 %v538_v43  ;;  %v518_v6 = vadd.f32 1.0, %v1980_v60 }
 0x10e   : > { %1995 = vrcp.f32 %v514_v51 }
 0x10f   : > { %1997 = vpow2.f32 %v548_v46 }
 0x110   : > { %1999 = vrcp.f32 %v515_v59 }
 0x111   : > { %v1982_v5 = vpop.eup %1981  ;;  %2001 = vpow2.f32 %v540_v57 }
 0x112   : > { %v1984_v8 = vpop.eup %1983  ;;  %v645_v10 = vadd.f32 %v1982_v5, %v633_v47  ;;  %2003 = vrcp.f32 %v518_v6  ;;  %v685_v50 = vsel %vm681_vm9, %v1974_v49, %v1982_v5 }
 0x113   : > { %v1986_v11 = vpop.eup %1985  ;;  %2005 = vpow2.f32 %v542_v2 }
 0x114   : > { %v1988_v48 = vpop.eup %1987  ;;  %v653_v12 = vmul.f32 8.0, %v645_v10  ;;  %v649_v13 = vadd.f32 %v1986_v11, %v2209_v62  ;;  %v689_v14 = vsel %vm683_vm10, %v1978_v58, %v1986_v11  ;;  %2007 = vpow2.f32 %v550_v7  ;;  %v702_v62 = vpop.permute.xlu1 %701 }
 0x115   : > { %v1990_v15 = vpop.eup %1989  ;;  %v519_v16 = vadd.f32 1.0, %v1988_v48  ;;  %vm710_vm15 = vcmp.eq.s32.totalorder %v702_v62, 1 }
 0x116   : > { %v713_v53 = vsel %vm709_vm11, %v653_v12, %v685_v50  ;;  %v646_v17 = vadd.f32 %v1990_v15, %v634_v40  ;;  %v657_v18 = vmul.f32 8.0, %v649_v13  ;;  %v1992_v19 = vpop.eup %1991 }
 0x117   : > { %2009 = vrcp.f32 %v519_v16  ;;  %721 = vxpose.xlu0.b32.start.end [1/1] (short) %v713_v53, 128  ;;  %v1994_v20 = vpop.eup %1993  ;;  %v650_v23 = vadd.f32 %v1992_v19, %v2212_v63  ;;  %v690_v24 = vsel %vm683_vm10, %v1984_v8, %v1992_v19 }
 0x118   : > { %v654_v21 = vmul.f32 8.0, %v646_v17  ;;  %v717_v22 = vsel %vm711_vm12, %v657_v18, %v689_v14  ;;  %v1996_v25 = vpop.eup %1995  ;;  %v686_v26 = vsel %vm681_vm9, %v1994_v20, %v1990_v15  ;;  %v708_v35 = vpop.permute.xlu1 %707 }
 0x119   : > { %v1998_v27 = vpop.eup %1997  ;;  %v647_v29 = vadd.f32 %v1996_v25, %v2215_v0  ;;  %v658_v31 = vmul.f32 8.0, %v650_v23  ;;  %vm712_vm0 = vcmp.eq.s32.totalorder %v708_v35, 1 }
 0x11a   : > { %v714_v30 = vsel %vm709_vm11, %v654_v21, %v686_v26  ;;  %v2000_v32 = vpop.eup %1999 }
 0x11b   : > { %753 = vxpose.xlu1.b32.start.end [1/1] (short) %v714_v30, 128  ;;  %v2002_v63 = vpop.eup %2001  ;;  %v648_v33 = vadd.f32 %v2000_v32, %v2218_v1  ;;  %v655_v34 = vmul.f32 8.0, %v647_v29  ;;  %v718_v28 = vsel %vm711_vm12, %v658_v31, %v690_v24 }
 0x11c   : > { %v2004_v36 = vpop.eup %2003  ;;  %v687_v0 = vsel %vm682_vm13, %v2002_v63, %v1996_v25 }
 0x11d   : > { %v2006_v37 = vpop.eup %2005  ;;  %v656_v38 = vmul.f32 8.0, %v648_v33  ;;  %v651_v39 = vadd.f32 %v2004_v36, %v2221_v3  ;;  %v691_v42 = vsel %vm684_vm14, %v1998_v27, %v2004_v36  ;;  %v715_v43 = vsel %vm710_vm15, %v655_v34, %v687_v0 }
 0x11e   : > { %v2008_v1 = vpop.eup %2007  ;;  %v688_v41 = vsel %vm682_vm13, %v2006_v37, %v2000_v32 }
 0x11f   : > { %v659_v44 = vmul.f32 8.0, %v651_v39  ;;  %v716_v46 = vsel %vm710_vm15, %v656_v38, %v688_v41 }
 0x121   : > { %v2010_v49 = vpop.eup %2009  ;;  %v2282_v54 = vsel %vm712_vm0, %v659_v44, %v691_v42 }
 0x122   : > { %v652_v51 = vadd.f32 %v2010_v49, %v2224_v4  ;;  %v692_v3 = vsel %vm684_vm14, %v2008_v1, %v2010_v49 }
 0x124   : > { %v660_v55 = vmul.f32 8.0, %v652_v51 }
 0x126   : > { %v2284_v56 = vsel %vm712_vm0, %v660_v55, %v692_v3 }
 0x154   : > { %1108 = vxpose.xlu0.b32.start.end [1/1] (short) %v717_v22, 128 }
 0x158   : > { %1140 = vxpose.xlu1.b32.start.end [1/1] (short) %v718_v28, 128 }
 0x191   : > { %850 = vxpose.xlu0.b32.start.end [1/1] (short) %v715_v43, 128 }
 0x195   : > { %882 = vxpose.xlu1.b32.start.end [1/1] (short) %v716_v46, 128 }
 0x197   : > { %v737_v4 = vpop.trf.xlu0 }
 0x198   : > { %786 = vst.msk [vmem:[%s2296_s16] sm:$0xff] %vm785_vm1, %v737_v4  ;;  %818 = vst.msk [vmem:[%s2291_s13] sm:$0xff] %vm785_vm1, %v737_v4 }
 0x19b   : > { %v769_v45 = vpop.trf.xlu1  ;;  %v738_v57 = vpop.trf.xlu0 }
 0x19c   : > { %802 = vst.msk [vmem:[%s2296_s16 + $0x80] sm:$0xff] %vm785_vm1, %v769_v45  ;;  %834 = vst.msk [vmem:[%s2291_s13 + $0x80] sm:$0xff] %vm785_vm1, %v769_v45 }
 0x19d   : > { %787 = vst.msk [vmem:[%s2296_s16 + $0x8] sm:$0xff] %vm785_vm1, %v738_v57  ;;  %819 = vst.msk [vmem:[%s2291_s13 + $0x8] sm:$0xff] %vm785_vm1, %v738_v57 }
 0x19f   : > { %v770_v58 = vpop.trf.xlu1  ;;  %v739_v59 = vpop.trf.xlu0 }
 0x1a0   : > { %803 = vst.msk [vmem:[%s2296_s16 + $0x88] sm:$0xff] %vm785_vm1, %v770_v58  ;;  %835 = vst.msk [vmem:[%s2291_s13 + $0x88] sm:$0xff] %vm785_vm1, %v770_v58 }
 0x1a1   : > { %788 = vst.msk [vmem:[%s2296_s16 + $0x10] sm:$0xff] %vm785_vm1, %v739_v59  ;;  %820 = vst.msk [vmem:[%s2291_s13 + $0x10] sm:$0xff] %vm785_vm1, %v739_v59 }
 0x1a3   : > { %v771_v60 = vpop.trf.xlu1  ;;  %v740_v61 = vpop.trf.xlu0 }
 0x1a4   : > { %804 = vst.msk [vmem:[%s2296_s16 + $0x90] sm:$0xff] %vm785_vm1, %v771_v60  ;;  %836 = vst.msk [vmem:[%s2291_s13 + $0x90] sm:$0xff] %vm785_vm1, %v771_v60 }
 0x1a5   : > { %789 = vst.msk [vmem:[%s2296_s16 + $0x18] sm:$0xff] %vm785_vm1, %v740_v61  ;;  %821 = vst.msk [vmem:[%s2291_s13 + $0x18] sm:$0xff] %vm785_vm1, %v740_v61 }
 0x1a7   : > { %v772_v2 = vpop.trf.xlu1  ;;  %v741_v5 = vpop.trf.xlu0 }
 0x1a8   : > { %805 = vst.msk [vmem:[%s2296_s16 + $0x98] sm:$0xff] %vm785_vm1, %v772_v2  ;;  %837 = vst.msk [vmem:[%s2291_s13 + $0x98] sm:$0xff] %vm785_vm1, %v772_v2 }
 0x1a9   : > { %790 = vst.msk [vmem:[%s2296_s16 + $0x20] sm:$0xff] %vm785_vm1, %v741_v5  ;;  %822 = vst.msk [vmem:[%s2291_s13 + $0x20] sm:$0xff] %vm785_vm1, %v741_v5 }
 0x1ab   : > { %v773_v47 = vpop.trf.xlu1  ;;  %v742_v6 = vpop.trf.xlu0 }
 0x1ac   : > { %806 = vst.msk [vmem:[%s2296_s16 + $0xa0] sm:$0xff] %vm785_vm1, %v773_v47  ;;  %838 = vst.msk [vmem:[%s2291_s13 + $0xa0] sm:$0xff] %vm785_vm1, %v773_v47 }
 0x1ad   : > { %791 = vst.msk [vmem:[%s2296_s16 + $0x28] sm:$0xff] %vm785_vm1, %v742_v6  ;;  %823 = vst.msk [vmem:[%s2291_s13 + $0x28] sm:$0xff] %vm785_vm1, %v742_v6 }
 0x1af   : > { %v774_v7 = vpop.trf.xlu1  ;;  %v743_v8 = vpop.trf.xlu0 }
 0x1b0   : > { %807 = vst.msk [vmem:[%s2296_s16 + $0xa8] sm:$0xff] %vm785_vm1, %v774_v7  ;;  %839 = vst.msk [vmem:[%s2291_s13 + $0xa8] sm:$0xff] %vm785_vm1, %v774_v7 }
 0x1b1   : > { %792 = vst.msk [vmem:[%s2296_s16 + $0x30] sm:$0xff] %vm785_vm1, %v743_v8  ;;  %824 = vst.msk [vmem:[%s2291_s13 + $0x30] sm:$0xff] %vm785_vm1, %v743_v8 }
 0x1b3   : > { %v775_v9 = vpop.trf.xlu1  ;;  %v744_v10 = vpop.trf.xlu0 }
 0x1b4   : > { %808 = vst.msk [vmem:[%s2296_s16 + $0xb0] sm:$0xff] %vm785_vm1, %v775_v9  ;;  %840 = vst.msk [vmem:[%s2291_s13 + $0xb0] sm:$0xff] %vm785_vm1, %v775_v9 }
 0x1b5   : > { %793 = vst.msk [vmem:[%s2296_s16 + $0x38] sm:$0xff] %vm785_vm1, %v744_v10  ;;  %825 = vst.msk [vmem:[%s2291_s13 + $0x38] sm:$0xff] %vm785_vm1, %v744_v10 }
 0x1b7   : > { %v776_v11 = vpop.trf.xlu1  ;;  %v745_v40 = vpop.trf.xlu0 }
 0x1b8   : > { %809 = vst.msk [vmem:[%s2296_s16 + $0xb8] sm:$0xff] %vm785_vm1, %v776_v11  ;;  %841 = vst.msk [vmem:[%s2291_s13 + $0xb8] sm:$0xff] %vm785_vm1, %v776_v11 }
 0x1b9   : > { %794 = vst.msk [vmem:[%s2296_s16 + $0x40] sm:$0xff] %vm785_vm1, %v745_v40  ;;  %826 = vst.msk [vmem:[%s2291_s13 + $0x40] sm:$0xff] %vm785_vm1, %v745_v40 }
 0x1bb   : > { %v777_v48 = vpop.trf.xlu1  ;;  %v746_v52 = vpop.trf.xlu0 }
 0x1bc   : > { %810 = vst.msk [vmem:[%s2296_s16 + $0xc0] sm:$0xff] %vm785_vm1, %v777_v48  ;;  %842 = vst.msk [vmem:[%s2291_s13 + $0xc0] sm:$0xff] %vm785_vm1, %v777_v48 }
 0x1bd   : > { %795 = vst.msk [vmem:[%s2296_s16 + $0x48] sm:$0xff] %vm785_vm1, %v746_v52  ;;  %827 = vst.msk [vmem:[%s2291_s13 + $0x48] sm:$0xff] %vm785_vm1, %v746_v52 }
 0x1bf   : > { %v778_v12 = vpop.trf.xlu1  ;;  %v747_v13 = vpop.trf.xlu0 }
 0x1c0   : > { %811 = vst.msk [vmem:[%s2296_s16 + $0xc8] sm:$0xff] %vm785_vm1, %v778_v12  ;;  %843 = vst.msk [vmem:[%s2291_s13 + $0xc8] sm:$0xff] %vm785_vm1, %v778_v12 }
 0x1c1   : > { %796 = vst.msk [vmem:[%s2296_s16 + $0x50] sm:$0xff] %vm785_vm1, %v747_v13  ;;  %828 = vst.msk [vmem:[%s2291_s13 + $0x50] sm:$0xff] %vm785_vm1, %v747_v13 }
 0x1c3   : > { %v779_v14 = vpop.trf.xlu1  ;;  %v748_v15 = vpop.trf.xlu0 }
 0x1c4   : > { %812 = vst.msk [vmem:[%s2296_s16 + $0xd0] sm:$0xff] %vm785_vm1, %v779_v14  ;;  %844 = vst.msk [vmem:[%s2291_s13 + $0xd0] sm:$0xff] %vm785_vm1, %v779_v14 }
 0x1c5   : > { %797 = vst.msk [vmem:[%s2296_s16 + $0x58] sm:$0xff] %vm785_vm1, %v748_v15  ;;  %829 = vst.msk [vmem:[%s2291_s13 + $0x58] sm:$0xff] %vm785_vm1, %v748_v15 }
 0x1c7   : > { %v780_v16 = vpop.trf.xlu1  ;;  %v749_v50 = vpop.trf.xlu0 }
 0x1c8   : > { %813 = vst.msk [vmem:[%s2296_s16 + $0xd8] sm:$0xff] %vm785_vm1, %v780_v16  ;;  %845 = vst.msk [vmem:[%s2291_s13 + $0xd8] sm:$0xff] %vm785_vm1, %v780_v16 }
 0x1c9   : > { %798 = vst.msk [vmem:[%s2296_s16 + $0x60] sm:$0xff] %vm785_vm1, %v749_v50  ;;  %830 = vst.msk [vmem:[%s2291_s13 + $0x60] sm:$0xff] %vm785_vm1, %v749_v50 }
 0x1cb   : > { %v781_v53 = vpop.trf.xlu1  ;;  %v750_v17 = vpop.trf.xlu0 }
 0x1cc   : > { %814 = vst.msk [vmem:[%s2296_s16 + $0xe0] sm:$0xff] %vm785_vm1, %v781_v53  ;;  %846 = vst.msk [vmem:[%s2291_s13 + $0xe0] sm:$0xff] %vm785_vm1, %v781_v53 }
 0x1cd   : > { %799 = vst.msk [vmem:[%s2296_s16 + $0x68] sm:$0xff] %vm785_vm1, %v750_v17  ;;  %831 = vst.msk [vmem:[%s2291_s13 + $0x68] sm:$0xff] %vm785_vm1, %v750_v17 }
 0x1cf   : > { %v782_v18 = vpop.trf.xlu1  ;;  %v751_v19 = vpop.trf.xlu0  ;;  %1366 = vxpose.xlu0.b32.start.end [1/1] (short) %v2282_v54, 128 }
 0x1d0   : > { %815 = vst.msk [vmem:[%s2296_s16 + $0xe8] sm:$0xff] %vm785_vm1, %v782_v18  ;;  %847 = vst.msk [vmem:[%s2291_s13 + $0xe8] sm:$0xff] %vm785_vm1, %v782_v18 }
 0x1d1   : > { %800 = vst.msk [vmem:[%s2296_s16 + $0x70] sm:$0xff] %vm785_vm1, %v751_v19  ;;  %832 = vst.msk [vmem:[%s2291_s13 + $0x70] sm:$0xff] %vm785_vm1, %v751_v19 }
 0x1d3   : > { %v783_v20 = vpop.trf.xlu1  ;;  %1398 = vxpose.xlu1.b32.start.end [1/1] (short) %v2284_v56, 128  ;;  %v752_v62 = vpop.trf.xlu0 }
 0x1d4   : > { %816 = vst.msk [vmem:[%s2296_s16 + $0xf0] sm:$0xff] %vm785_vm1, %v783_v20  ;;  %848 = vst.msk [vmem:[%s2291_s13 + $0xf0] sm:$0xff] %vm785_vm1, %v783_v20 }
 0x1d5   : > { %801 = vst.msk [vmem:[%s2296_s16 + $0x78] sm:$0xff] %vm785_vm1, %v752_v62  ;;  %833 = vst.msk [vmem:[%s2291_s13 + $0x78] sm:$0xff] %vm785_vm1, %v752_v62 }
 0x1d7   : > { %v2424_v21 = vpop.trf.xlu0  ;;  %v784_v22 = vpop.trf.xlu1 }
 0x1d8   : > { %1841 = vst.msk [vmem:[%s2296_s16 + $0x200] sm:$0xff] %vm785_vm1, %v2424_v21  ;;  %817 = vst.msk [vmem:[%s2296_s16 + $0xf8] sm:$0xff] %vm785_vm1, %v784_v22 }
 0x1d9   : > { %849 = vst.msk [vmem:[%s2291_s13 + $0xf8] sm:$0xff] %vm785_vm1, %v784_v22 }
 0x1db   : > { %v2433_v23 = vpop.trf.xlu0  ;;  %v2435_v24 = vpop.trf.xlu1 }
 0x1dc   : > { %1842 = vst.msk [vmem:[%s2296_s16 + $0x208] sm:$0xff] %vm785_vm1, %v2433_v23  ;;  %1857 = vst.msk [vmem:[%s2296_s16 + $0x280] sm:$0xff] %vm785_vm1, %v2435_v24 }
 0x1df   : > { %v2443_v25 = vpop.trf.xlu0  ;;  %v2445_v26 = vpop.trf.xlu1 }
 0x1e0   : > { %1843 = vst.msk [vmem:[%s2296_s16 + $0x210] sm:$0xff] %vm785_vm1, %v2443_v25  ;;  %1858 = vst.msk [vmem:[%s2296_s16 + $0x288] sm:$0xff] %vm785_vm1, %v2445_v26 }
 0x1e3   : > { %v2453_v27 = vpop.trf.xlu0  ;;  %v2455_v29 = vpop.trf.xlu1 }
 0x1e4   : > { %1844 = vst.msk [vmem:[%s2296_s16 + $0x218] sm:$0xff] %vm785_vm1, %v2453_v27  ;;  %1859 = vst.msk [vmem:[%s2296_s16 + $0x290] sm:$0xff] %vm785_vm1, %v2455_v29 }
 0x1e7   : > { %v2463_v30 = vpop.trf.xlu0  ;;  %v2465_v31 = vpop.trf.xlu1 }
 0x1e8   : > { %1845 = vst.msk [vmem:[%s2296_s16 + $0x220] sm:$0xff] %vm785_vm1, %v2463_v30  ;;  %1860 = vst.msk [vmem:[%s2296_s16 + $0x298] sm:$0xff] %vm785_vm1, %v2465_v31 }
 0x1eb   : > { %v2473_v32 = vpop.trf.xlu0  ;;  %v2475_v63 = vpop.trf.xlu1 }
 0x1ec   : > { %1846 = vst.msk [vmem:[%s2296_s16 + $0x228] sm:$0xff] %vm785_vm1, %v2473_v32  ;;  %1861 = vst.msk [vmem:[%s2296_s16 + $0x2a0] sm:$0xff] %vm785_vm1, %v2475_v63 }
 0x1ef   : > { %v2483_v33 = vpop.trf.xlu0  ;;  %v2485_v34 = vpop.trf.xlu1 }
 0x1f0   : > { %1847 = vst.msk [vmem:[%s2296_s16 + $0x230] sm:$0xff] %vm785_vm1, %v2483_v33  ;;  %1862 = vst.msk [vmem:[%s2296_s16 + $0x2a8] sm:$0xff] %vm785_vm1, %v2485_v34 }
 0x1f3   : > { %v2493_v35 = vpop.trf.xlu0  ;;  %v2495_v28 = vpop.trf.xlu1 }
 0x1f4   : > { %1848 = vst.msk [vmem:[%s2296_s16 + $0x238] sm:$0xff] %vm785_vm1, %v2493_v35  ;;  %1863 = vst.msk [vmem:[%s2296_s16 + $0x2b0] sm:$0xff] %vm785_vm1, %v2495_v28 }
 0x1f7   : > { %v2503_v36 = vpop.trf.xlu0  ;;  %v2505_v0 = vpop.trf.xlu1 }
 0x1f8   : > { %1849 = vst.msk [vmem:[%s2296_s16 + $0x240] sm:$0xff] %vm785_vm1, %v2503_v36  ;;  %1864 = vst.msk [vmem:[%s2296_s16 + $0x2b8] sm:$0xff] %vm785_vm1, %v2505_v0 }
 0x1fb   : > { %v2513_v37 = vpop.trf.xlu0  ;;  %v2515_v38 = vpop.trf.xlu1 }
 0x1fc   : > { %1850 = vst.msk [vmem:[%s2296_s16 + $0x248] sm:$0xff] %vm785_vm1, %v2513_v37  ;;  %1865 = vst.msk [vmem:[%s2296_s16 + $0x2c0] sm:$0xff] %vm785_vm1, %v2515_v38 }
 0x1ff   : > { %v2523_v39 = vpop.trf.xlu0  ;;  %v2525_v42 = vpop.trf.xlu1 }
 0x200   : > { %1851 = vst.msk [vmem:[%s2296_s16 + $0x250] sm:$0xff] %vm785_vm1, %v2523_v39  ;;  %1866 = vst.msk [vmem:[%s2296_s16 + $0x2c8] sm:$0xff] %vm785_vm1, %v2525_v42 }
 0x203   : > { %v2533_v43 = vpop.trf.xlu0  ;;  %v2535_v1 = vpop.trf.xlu1 }
 0x204   : > { %1852 = vst.msk [vmem:[%s2296_s16 + $0x258] sm:$0xff] %vm785_vm1, %v2533_v43  ;;  %1867 = vst.msk [vmem:[%s2296_s16 + $0x2d0] sm:$0xff] %vm785_vm1, %v2535_v1 }
 0x207   : > { %v2543_v41 = vpop.trf.xlu0  ;;  %v2545_v44 = vpop.trf.xlu1 }
 0x208   : > { %1853 = vst.msk [vmem:[%s2296_s16 + $0x260] sm:$0xff] %vm785_vm1, %v2543_v41  ;;  %1868 = vst.msk [vmem:[%s2296_s16 + $0x2d8] sm:$0xff] %vm785_vm1, %v2545_v44 }
 0x20b   : > { %v2553_v46 = vpop.trf.xlu0  ;;  %v2555_v49 = vpop.trf.xlu1 }
 0x20c   : > { %1854 = vst.msk [vmem:[%s2296_s16 + $0x268] sm:$0xff] %vm785_vm1, %v2553_v46  ;;  %1869 = vst.msk [vmem:[%s2296_s16 + $0x2e0] sm:$0xff] %vm785_vm1, %v2555_v49 }
 0x20f   : > { %v2563_v51 = vpop.trf.xlu0  ;;  %v2565_v3 = vpop.trf.xlu1 }
 0x210   : > { %1855 = vst.msk [vmem:[%s2296_s16 + $0x270] sm:$0xff] %vm785_vm1, %v2563_v51  ;;  %1870 = vst.msk [vmem:[%s2296_s16 + $0x2e8] sm:$0xff] %vm785_vm1, %v2565_v3 }
 0x213   : > { %v2573_v54 = vpop.trf.xlu0  ;;  %v2575_v55 = vpop.trf.xlu1 }
 0x214   : > { %1856 = vst.msk [vmem:[%s2296_s16 + $0x278] sm:$0xff] %vm785_vm1, %v2573_v54  ;;  %1871 = vst.msk [vmem:[%s2296_s16 + $0x2f0] sm:$0xff] %vm785_vm1, %v2575_v55 }
 0x217   : > { %v866_v56 = vpop.trf.xlu0  ;;  %v2583_v4 = vpop.trf.xlu1 }
 0x218   : > { %1809 = vst.msk [vmem:[%s2296_s16 + $0x100] sm:$0xff] %vm785_vm1, %v866_v56  ;;  %1872 = vst.msk [vmem:[%s2296_s16 + $0x2f8] sm:$0xff] %vm785_vm1, %v2583_v4 }
 0x21b   : > { %v867_v45 = vpop.trf.xlu0  ;;  %v898_v57 = vpop.trf.xlu1 }
 0x21c   : > { %1810 = vst.msk [vmem:[%s2296_s16 + $0x108] sm:$0xff] %vm785_vm1, %v867_v45  ;;  %1825 = vst.msk [vmem:[%s2296_s16 + $0x180] sm:$0xff] %vm785_vm1, %v898_v57 }
 0x21f   : > { %v868_v58 = vpop.trf.xlu0  ;;  %v2594_v59 = vpop.trf.xlu1 }
 0x220   : > { %1811 = vst.msk [vmem:[%s2296_s16 + $0x110] sm:$0xff] %vm785_vm1, %v868_v58  ;;  %1826 = vst.msk [vmem:[%s2296_s16 + $0x188] sm:$0xff] %vm785_vm1, %v2594_v59 }
 0x223   : > { %v869_v60 = vpop.trf.xlu0  ;;  %v900_v61 = vpop.trf.xlu1 }
 0x224   : > { %1812 = vst.msk [vmem:[%s2296_s16 + $0x118] sm:$0xff] %vm785_vm1, %v869_v60  ;;  %1827 = vst.msk [vmem:[%s2296_s16 + $0x190] sm:$0xff] %vm785_vm1, %v900_v61 }
 0x227   : > { %v870_v2 = vpop.trf.xlu0  ;;  %v2605_v5 = vpop.trf.xlu1 }
 0x228   : > { %1813 = vst.msk [vmem:[%s2296_s16 + $0x120] sm:$0xff] %vm785_vm1, %v870_v2  ;;  %1828 = vst.msk [vmem:[%s2296_s16 + $0x198] sm:$0xff] %vm785_vm1, %v2605_v5 }
 0x22b   : > { %v871_v47 = vpop.trf.xlu0  ;;  %v902_v6 = vpop.trf.xlu1 }
 0x22c   : > { %1814 = vst.msk [vmem:[%s2296_s16 + $0x128] sm:$0xff] %vm785_vm1, %v871_v47  ;;  %1829 = vst.msk [vmem:[%s2296_s16 + $0x1a0] sm:$0xff] %vm785_vm1, %v902_v6 }
 0x22d   : > { %981 = vrot.lane.b32.xlu1 %v867_v45, %s2036_s21 }
 0x22f   : > { %v872_v7 = vpop.trf.xlu0  ;;  %v903_v8 = vpop.trf.xlu1 }
 0x230   : > { %1815 = vst.msk [vmem:[%s2296_s16 + $0x130] sm:$0xff] %vm785_vm1, %v872_v7  ;;  %1830 = vst.msk [vmem:[%s2296_s16 + $0x1a8] sm:$0xff] %vm785_vm1, %v903_v8 }
 0x231   : > { %985 = vrot.lane.b32.xlu1 %v869_v60, %s2036_s21 }
 0x233   : > { %v873_v9 = vpop.trf.xlu0  ;;  %v904_v10 = vpop.trf.xlu1 }
 0x234   : > { %1816 = vst.msk [vmem:[%s2296_s16 + $0x138] sm:$0xff] %vm785_vm1, %v873_v9  ;;  %1831 = vst.msk [vmem:[%s2296_s16 + $0x1b0] sm:$0xff] %vm785_vm1, %v904_v10  ;;  %979 = vrot.lane.b32.xlu0 %v866_v56, %s2036_s21 }
 0x235   : > { %989 = vrot.lane.b32.xlu1 %v871_v47, %s2036_s21 }
 0x237   : > { %v874_v11 = vpop.trf.xlu0  ;;  %v905_v40 = vpop.trf.xlu1 }
 0x238   : > { %1817 = vst.msk [vmem:[%s2296_s16 + $0x140] sm:$0xff] %vm785_vm1, %v874_v11  ;;  %1832 = vst.msk [vmem:[%s2296_s16 + $0x1b8] sm:$0xff] %vm785_vm1, %v905_v40  ;;  %1011 = vrot.lane.b32.xlu0 %v898_v57, %s2036_s21 }
 0x239   : > { %993 = vrot.lane.b32.xlu1 %v873_v9, %s2036_s21 }
 0x23b   : > { %v875_v48 = vpop.trf.xlu0  ;;  %v906_v52 = vpop.trf.xlu1 }
 0x23c   : > { %1818 = vst.msk [vmem:[%s2296_s16 + $0x148] sm:$0xff] %vm785_vm1, %v875_v48  ;;  %1833 = vst.msk [vmem:[%s2296_s16 + $0x1c0] sm:$0xff] %vm785_vm1, %v906_v52  ;;  %983 = vrot.lane.b32.xlu0 %v868_v58, %s2036_s21 }
 0x23d   : > { %997 = vrot.lane.b32.xlu1 %v875_v48, %s2036_s21 }
 0x23f   : > { %v876_v12 = vpop.trf.xlu0  ;;  %v907_v13 = vpop.trf.xlu1 }
 0x240   : > { %1819 = vst.msk [vmem:[%s2296_s16 + $0x150] sm:$0xff] %vm785_vm1, %v876_v12  ;;  %1834 = vst.msk [vmem:[%s2296_s16 + $0x1c8] sm:$0xff] %vm785_vm1, %v907_v13  ;;  %1015 = vrot.lane.b32.xlu0 %v900_v61, %s2036_s21 }
 0x243   : > { %v877_v14 = vpop.trf.xlu0  ;;  %v908_v15 = vpop.trf.xlu1 }
 0x244   : > { %1820 = vst.msk [vmem:[%s2296_s16 + $0x158] sm:$0xff] %vm785_vm1, %v877_v14  ;;  %1835 = vst.msk [vmem:[%s2296_s16 + $0x1d0] sm:$0xff] %vm785_vm1, %v908_v15  ;;  %987 = vrot.lane.b32.xlu0 %v870_v2, %s2036_s21  ;;  %1001 = vrot.lane.b32.xlu1 %v877_v14, %s2036_s21 }
 0x247   : > { %v878_v16 = vpop.trf.xlu0  ;;  %v909_v50 = vpop.trf.xlu1 }
 0x248   : > { %1821 = vst.msk [vmem:[%s2296_s16 + $0x160] sm:$0xff] %vm785_vm1, %v878_v16  ;;  %1836 = vst.msk [vmem:[%s2296_s16 + $0x1d8] sm:$0xff] %vm785_vm1, %v909_v50  ;;  %1019 = vrot.lane.b32.xlu0 %v902_v6, %s2036_s21 }
 0x24b   : > { %v879_v53 = vpop.trf.xlu0  ;;  %v910_v17 = vpop.trf.xlu1 }
 0x24c   : > { %1822 = vst.msk [vmem:[%s2296_s16 + $0x168] sm:$0xff] %vm785_vm1, %v879_v53  ;;  %1837 = vst.msk [vmem:[%s2296_s16 + $0x1e0] sm:$0xff] %vm785_vm1, %v910_v17  ;;  %991 = vrot.lane.b32.xlu0 %v872_v7, %s2036_s21  ;;  %1005 = vrot.lane.b32.xlu1 %v879_v53, %s2036_s21 }
 0x24f   : > { %v911_v18 = vpop.trf.xlu1  ;;  %v880_v19 = vpop.trf.xlu0 }
 0x250   : > { %1838 = vst.msk [vmem:[%s2296_s16 + $0x1e8] sm:$0xff] %vm785_vm1, %v911_v18  ;;  %1023 = vrot.lane.b32.xlu0 %v904_v10, %s2036_s21  ;;  %1013 = vrot.lane.b32.xlu1 %v2594_v59, %s2036_s21  ;;  %1823 = vst.msk [vmem:[%s2296_s16 + $0x170] sm:$0xff] %vm785_vm1, %v880_v19 }
 0x253   : > { %v912_v20 = vpop.trf.xlu1  ;;  %v881_v62 = vpop.trf.xlu0 }
 0x254   : > { %1839 = vst.msk [vmem:[%s2296_s16 + $0x1f0] sm:$0xff] %vm785_vm1, %v912_v20  ;;  %995 = vrot.lane.b32.xlu0 %v874_v11, %s2036_s21  ;;  %1017 = vrot.lane.b32.xlu1 %v2605_v5, %s2036_s21  ;;  %1824 = vst.msk [vmem:[%s2296_s16 + $0x178] sm:$0xff] %vm785_vm1, %v881_v62 }
 0x257   : > { %v913_v22 = vpop.trf.xlu1  ;;  %v2676_v56 = vpop.trf.xlu0 }
 0x258   : > { %1840 = vst.msk [vmem:[%s2296_s16 + $0x1f8] sm:$0xff] %vm785_vm1, %v913_v22  ;;  %1027 = vrot.lane.b32.xlu0 %v906_v52, %s2036_s21  ;;  %1021 = vrot.lane.b32.xlu1 %v903_v8, %s2036_s21  ;;  %1873 = vst.msk [vmem:[%s2296_s16 + $0x300] sm:$0xff] %vm785_vm1, %v2676_v56 }
 0x25b   : > { %v2685_v45 = vpop.trf.xlu1  ;;  %v2687_v57 = vpop.trf.xlu0 }
 0x25c   : > { %1889 = vst.msk [vmem:[%s2296_s16 + $0x380] sm:$0xff] %vm785_vm1, %v2685_v45  ;;  %999 = vrot.lane.b32.xlu0 %v876_v12, %s2036_s21  ;;  %1025 = vrot.lane.b32.xlu1 %v905_v40, %s2036_s21  ;;  %1874 = vst.msk [vmem:[%s2296_s16 + $0x308] sm:$0xff] %vm785_vm1, %v2687_v57 }
 0x25f   : > { %v2697_v58 = vpop.trf.xlu1  ;;  %v2699_v59 = vpop.trf.xlu0 }
 0x260   : > { %1890 = vst.msk [vmem:[%s2296_s16 + $0x388] sm:$0xff] %vm785_vm1, %v2697_v58  ;;  %1031 = vrot.lane.b32.xlu0 %v908_v15, %s2036_s21  ;;  %1029 = vrot.lane.b32.xlu1 %v907_v13, %s2036_s21  ;;  %1875 = vst.msk [vmem:[%s2296_s16 + $0x310] sm:$0xff] %vm785_vm1, %v2699_v59 }
 0x263   : > { %v2709_v60 = vpop.trf.xlu1  ;;  %v2711_v61 = vpop.trf.xlu0 }
 0x264   : > { %1891 = vst.msk [vmem:[%s2296_s16 + $0x390] sm:$0xff] %vm785_vm1, %v2709_v60  ;;  %1003 = vrot.lane.b32.xlu0 %v878_v16, %s2036_s21  ;;  %1033 = vrot.lane.b32.xlu1 %v909_v50, %s2036_s21  ;;  %1876 = vst.msk [vmem:[%s2296_s16 + $0x318] sm:$0xff] %vm785_vm1, %v2711_v61 }
 0x267   : > { %v2721_v2 = vpop.trf.xlu1  ;;  %v2723_v5 = vpop.trf.xlu0 }
 0x268   : > { %1892 = vst.msk [vmem:[%s2296_s16 + $0x398] sm:$0xff] %vm785_vm1, %v2721_v2  ;;  %1035 = vrot.lane.b32.xlu0 %v910_v17, %s2036_s21  ;;  %1037 = vrot.lane.b32.xlu1 %v911_v18, %s2036_s21  ;;  %1877 = vst.msk [vmem:[%s2296_s16 + $0x320] sm:$0xff] %vm785_vm1, %v2723_v5 }
 0x26b   : > { %v2733_v47 = vpop.trf.xlu1  ;;  %v2735_v6 = vpop.trf.xlu0 }
 0x26c   : > { %1893 = vst.msk [vmem:[%s2296_s16 + $0x3a0] sm:$0xff] %vm785_vm1, %v2733_v47  ;;  %1007 = vrot.lane.b32.xlu0 %v880_v19, %s2036_s21  ;;  %1009 = vrot.lane.b32.xlu1 %v881_v62, %s2036_s21  ;;  %1878 = vst.msk [vmem:[%s2296_s16 + $0x328] sm:$0xff] %vm785_vm1, %v2735_v6 }
 0x26f   : > { %v2745_v7 = vpop.trf.xlu1  ;;  %v2747_v8 = vpop.trf.xlu0 }
 0x270   : > { %1894 = vst.msk [vmem:[%s2296_s16 + $0x3a8] sm:$0xff] %vm785_vm1, %v2745_v7  ;;  %1039 = vrot.lane.b32.xlu0 %v912_v20, %s2036_s21  ;;  %1041 = vrot.lane.b32.xlu1 %v913_v22, %s2036_s21  ;;  %1879 = vst.msk [vmem:[%s2296_s16 + $0x330] sm:$0xff] %vm785_vm1, %v2747_v8 }
 0x273   : > { %v2757_v9 = vpop.trf.xlu1  ;;  %v2759_v10 = vpop.trf.xlu0 }
 0x274   : > { %1895 = vst.msk [vmem:[%s2296_s16 + $0x3b0] sm:$0xff] %vm785_vm1, %v2757_v9  ;;  %1237 = vrot.lane.b32.xlu0 %v2424_v21, %s2037_s17  ;;  %1239 = vrot.lane.b32.xlu1 %v2433_v23, %s2037_s17  ;;  %1880 = vst.msk [vmem:[%s2296_s16 + $0x338] sm:$0xff] %vm785_vm1, %v2759_v10 }
 0x277   : > { %v2771_v11 = vpop.trf.xlu1  ;;  %v2773_v40 = vpop.trf.xlu0 }
 0x278   : > { %1896 = vst.msk [vmem:[%s2296_s16 + $0x3b8] sm:$0xff] %vm785_vm1, %v2771_v11  ;;  %1241 = vrot.lane.b32.xlu0 %v2443_v25, %s2037_s17  ;;  %1243 = vrot.lane.b32.xlu1 %v2453_v27, %s2037_s17  ;;  %1881 = vst.msk [vmem:[%s2296_s16 + $0x340] sm:$0xff] %vm785_vm1, %v2773_v40 }
 0x27b   : > { %v2785_v21 = vpop.trf.xlu1  ;;  %v2787_v23 = vpop.trf.xlu0 }
 0x27c   : > { %1897 = vst.msk [vmem:[%s2296_s16 + $0x3c0] sm:$0xff] %vm785_vm1, %v2785_v21  ;;  %1245 = vrot.lane.b32.xlu0 %v2463_v30, %s2037_s17  ;;  %1247 = vrot.lane.b32.xlu1 %v2473_v32, %s2037_s17  ;;  %1882 = vst.msk [vmem:[%s2296_s16 + $0x348] sm:$0xff] %vm785_vm1, %v2787_v23 }
 0x27f   : > { %v2799_v25 = vpop.trf.xlu1  ;;  %v2801_v27 = vpop.trf.xlu0 }
 0x280   : > { %1898 = vst.msk [vmem:[%s2296_s16 + $0x3c8] sm:$0xff] %vm785_vm1, %v2799_v25  ;;  %1249 = vrot.lane.b32.xlu0 %v2483_v33, %s2037_s17  ;;  %1251 = vrot.lane.b32.xlu1 %v2493_v35, %s2037_s17  ;;  %1883 = vst.msk [vmem:[%s2296_s16 + $0x350] sm:$0xff] %vm785_vm1, %v2801_v27 }
 0x283   : > { %v2813_v30 = vpop.trf.xlu1  ;;  %v2815_v32 = vpop.trf.xlu0 }
 0x284   : > { %1899 = vst.msk [vmem:[%s2296_s16 + $0x3d0] sm:$0xff] %vm785_vm1, %v2813_v30  ;;  %1253 = vrot.lane.b32.xlu0 %v2503_v36, %s2037_s17  ;;  %1255 = vrot.lane.b32.xlu1 %v2513_v37, %s2037_s17  ;;  %1884 = vst.msk [vmem:[%s2296_s16 + $0x358] sm:$0xff] %vm785_vm1, %v2815_v32 }
 0x287   : > { %v2827_v33 = vpop.trf.xlu1  ;;  %v2829_v35 = vpop.trf.xlu0 }
 0x288   : > { %1900 = vst.msk [vmem:[%s2296_s16 + $0x3d8] sm:$0xff] %vm785_vm1, %v2827_v33  ;;  %1257 = vrot.lane.b32.xlu0 %v2523_v39, %s2037_s17  ;;  %1259 = vrot.lane.b32.xlu1 %v2533_v43, %s2037_s17  ;;  %1885 = vst.msk [vmem:[%s2296_s16 + $0x360] sm:$0xff] %vm785_vm1, %v2829_v35 }
 0x28b   : > { %v2841_v36 = vpop.trf.xlu1  ;;  %v2843_v37 = vpop.trf.xlu0 }
 0x28c   : > { %1901 = vst.msk [vmem:[%s2296_s16 + $0x3e0] sm:$0xff] %vm785_vm1, %v2841_v36  ;;  %1261 = vrot.lane.b32.xlu0 %v2543_v41, %s2037_s17  ;;  %1263 = vrot.lane.b32.xlu1 %v2553_v46, %s2037_s17  ;;  %1886 = vst.msk [vmem:[%s2296_s16 + $0x368] sm:$0xff] %vm785_vm1, %v2843_v37 }
 0x28f   : > { %v2855_v39 = vpop.trf.xlu1  ;;  %v2857_v43 = vpop.trf.xlu0 }
 0x290   : > { %1902 = vst.msk [vmem:[%s2296_s16 + $0x3e8] sm:$0xff] %vm785_vm1, %v2855_v39  ;;  %1265 = vrot.lane.b32.xlu0 %v2563_v51, %s2037_s17  ;;  %1267 = vrot.lane.b32.xlu1 %v2573_v54, %s2037_s17  ;;  %1887 = vst.msk [vmem:[%s2296_s16 + $0x370] sm:$0xff] %vm785_vm1, %v2857_v43 }
 0x293   : > { %v2869_v41 = vpop.trf.xlu1  ;;  %v2871_v46 = vpop.trf.xlu0 }
 0x294   : > { %1903 = vst.msk [vmem:[%s2296_s16 + $0x3f0] sm:$0xff] %vm785_vm1, %v2869_v41  ;;  %1269 = vrot.lane.b32.xlu0 %v2435_v24, %s2037_s17  ;;  %1271 = vrot.lane.b32.xlu1 %v2445_v26, %s2037_s17  ;;  %1888 = vst.msk [vmem:[%s2296_s16 + $0x378] sm:$0xff] %vm785_vm1, %v2871_v46 }
 0x297   : > { %v2883_v51 = vpop.trf.xlu1 }
 0x298   : > { %1904 = vst.msk [vmem:[%s2296_s16 + $0x3f8] sm:$0xff] %vm785_vm1, %v2883_v51  ;;  %1273 = vrot.lane.b32.xlu0 %v2455_v29, %s2037_s17  ;;  %1275 = vrot.lane.b32.xlu1 %v2465_v31, %s2037_s17 }
 0x29c   : > { %1277 = vrot.lane.b32.xlu0 %v2475_v63, %s2037_s17  ;;  %1279 = vrot.lane.b32.xlu1 %v2485_v34, %s2037_s17 }
 0x29f   : > { %v982_v24 = vpop.permute.xlu1 %981 }
 0x2a0   : > { %1077 = vst.msk [vmem:[%s2291_s13 + $0x8] sm:$0xff] %vm1075_vm2, %v982_v24  ;;  %1281 = vrot.lane.b32.xlu0 %v2495_v28, %s2037_s17  ;;  %1283 = vrot.lane.b32.xlu1 %v2505_v0, %s2037_s17 }
 0x2a3   : > { %v986_v26 = vpop.permute.xlu1 %985 }
 0x2a4   : > { %1079 = vst.msk [vmem:[%s2291_s13 + $0x18] sm:$0xff] %vm1075_vm2, %v986_v26  ;;  %1285 = vrot.lane.b32.xlu0 %v2515_v38, %s2037_s17  ;;  %1287 = vrot.lane.b32.xlu1 %v2525_v42, %s2037_s17 }
 0x2a6   : > { %v980_v29 = vpop.permute.xlu0 %979 }
 0x2a7   : > { %v990_v31 = vpop.permute.xlu1 %989  ;;  %1076 = vst.msk [vmem:[%s2291_s13] sm:$0xff] %vm1075_vm2, %v980_v29 }
 0x2a8   : > { %1081 = vst.msk [vmem:[%s2291_s13 + $0x28] sm:$0xff] %vm1075_vm2, %v990_v31  ;;  %1289 = vrot.lane.b32.xlu0 %v2535_v1, %s2037_s17  ;;  %1291 = vrot.lane.b32.xlu1 %v2545_v44, %s2037_s17 }
 0x2aa   : > { %v1012_v63 = vpop.permute.xlu0 %1011 }
 0x2ab   : > { %v994_v34 = vpop.permute.xlu1 %993  ;;  %1092 = vst.msk [vmem:[%s2291_s13 + $0x80] sm:$0xff] %vm1075_vm2, %v1012_v63 }
 0x2ac   : > { %1083 = vst.msk [vmem:[%s2291_s13 + $0x38] sm:$0xff] %vm1075_vm2, %v994_v34  ;;  %1293 = vrot.lane.b32.xlu0 %v2555_v49, %s2037_s17  ;;  %1295 = vrot.lane.b32.xlu1 %v2565_v3, %s2037_s17 }
 0x2ae   : > { %v984_v28 = vpop.permute.xlu0 %983 }
 0x2af   : > { %v998_v0 = vpop.permute.xlu1 %997  ;;  %1078 = vst.msk [vmem:[%s2291_s13 + $0x10] sm:$0xff] %vm1075_vm2, %v984_v28 }
 0x2b0   : > { %1085 = vst.msk [vmem:[%s2291_s13 + $0x48] sm:$0xff] %vm1075_vm2, %v998_v0  ;;  %1297 = vrot.lane.b32.xlu0 %v2575_v55, %s2037_s17  ;;  %1299 = vrot.lane.b32.xlu1 %v2583_v4, %s2037_s17 }
 0x2b2   : > { %v1016_v38 = vpop.permute.xlu0 %1015 }
 0x2b3   : > { %1094 = vst.msk [vmem:[%s2291_s13 + $0x90] sm:$0xff] %vm1075_vm2, %v1016_v38 }
 0x2b4   : > { %1495 = vrot.lane.b32.xlu0 %v2676_v56, %s2038_s18  ;;  %1497 = vrot.lane.b32.xlu1 %v2687_v57, %s2038_s18 }
 0x2b6   : > { %v1002_v42 = vpop.permute.xlu1 %1001  ;;  %v988_v1 = vpop.permute.xlu0 %987 }
 0x2b7   : > { %1087 = vst.msk [vmem:[%s2291_s13 + $0x58] sm:$0xff] %vm1075_vm2, %v1002_v42  ;;  %1080 = vst.msk [vmem:[%s2291_s13 + $0x20] sm:$0xff] %vm1075_vm2, %v988_v1 }
 0x2b8   : > { %1499 = vrot.lane.b32.xlu0 %v2699_v59, %s2038_s18  ;;  %1501 = vrot.lane.b32.xlu1 %v2711_v61, %s2038_s18 }
 0x2ba   : > { %v1020_v44 = vpop.permute.xlu0 %1019 }
 0x2bb   : > { %1096 = vst.msk [vmem:[%s2291_s13 + $0xa0] sm:$0xff] %vm1075_vm2, %v1020_v44 }
 0x2bc   : > { %1503 = vrot.lane.b32.xlu0 %v2723_v5, %s2038_s18  ;;  %1505 = vrot.lane.b32.xlu1 %v2735_v6, %s2038_s18 }
 0x2be   : > { %v1006_v49 = vpop.permute.xlu1 %1005  ;;  %v992_v3 = vpop.permute.xlu0 %991 }
 0x2bf   : > { %1089 = vst.msk [vmem:[%s2291_s13 + $0x68] sm:$0xff] %vm1075_vm2, %v1006_v49  ;;  %1082 = vst.msk [vmem:[%s2291_s13 + $0x30] sm:$0xff] %vm1075_vm2, %v992_v3 }
 0x2c0   : > { %1507 = vrot.lane.b32.xlu0 %v2747_v8, %s2038_s18  ;;  %1509 = vrot.lane.b32.xlu1 %v2759_v10, %s2038_s18 }
 0x2c2   : > { %v1014_v54 = vpop.permute.xlu1 %1013  ;;  %v1024_v55 = vpop.permute.xlu0 %1023 }
 0x2c3   : > { %1093 = vst.msk [vmem:[%s2291_s13 + $0x88] sm:$0xff] %vm1075_vm2, %v1014_v54  ;;  %1098 = vst.msk [vmem:[%s2291_s13 + $0xb0] sm:$0xff] %vm1075_vm2, %v1024_v55 }
 0x2c4   : > { %1511 = vrot.lane.b32.xlu0 %v2773_v40, %s2038_s18  ;;  %1513 = vrot.lane.b32.xlu1 %v2787_v23, %s2038_s18 }
 0x2c6   : > { %v1018_v4 = vpop.permute.xlu1 %1017  ;;  %v996_v48 = vpop.permute.xlu0 %995 }
 0x2c7   : > { %1095 = vst.msk [vmem:[%s2291_s13 + $0x98] sm:$0xff] %vm1075_vm2, %v1018_v4  ;;  %1084 = vst.msk [vmem:[%s2291_s13 + $0x40] sm:$0xff] %vm1075_vm2, %v996_v48 }
 0x2c8   : > { %1515 = vrot.lane.b32.xlu0 %v2801_v27, %s2038_s18  ;;  %1517 = vrot.lane.b32.xlu1 %v2815_v32, %s2038_s18 }
 0x2ca   : > { %v1022_v52 = vpop.permute.xlu1 %1021  ;;  %v1028_v12 = vpop.permute.xlu0 %1027 }
 0x2cb   : > { %1097 = vst.msk [vmem:[%s2291_s13 + $0xa8] sm:$0xff] %vm1075_vm2, %v1022_v52  ;;  %1100 = vst.msk [vmem:[%s2291_s13 + $0xc0] sm:$0xff] %vm1075_vm2, %v1028_v12 }
 0x2cc   : > { %1519 = vrot.lane.b32.xlu0 %v2829_v35, %s2038_s18  ;;  %1521 = vrot.lane.b32.xlu1 %v2843_v37, %s2038_s18 }
 0x2ce   : > { %v1026_v13 = vpop.permute.xlu1 %1025  ;;  %v1000_v14 = vpop.permute.xlu0 %999 }
 0x2cf   : > { %1099 = vst.msk [vmem:[%s2291_s13 + $0xb8] sm:$0xff] %vm1075_vm2, %v1026_v13  ;;  %1086 = vst.msk [vmem:[%s2291_s13 + $0x50] sm:$0xff] %vm1075_vm2, %v1000_v14 }
 0x2d0   : > { %1523 = vrot.lane.b32.xlu0 %v2857_v43, %s2038_s18  ;;  %1525 = vrot.lane.b32.xlu1 %v2871_v46, %s2038_s18 }
 0x2d2   : > { %v1030_v15 = vpop.permute.xlu1 %1029  ;;  %v1032_v16 = vpop.permute.xlu0 %1031 }
 0x2d3   : > { %1101 = vst.msk [vmem:[%s2291_s13 + $0xc8] sm:$0xff] %vm1075_vm2, %v1030_v15  ;;  %1102 = vst.msk [vmem:[%s2291_s13 + $0xd0] sm:$0xff] %vm1075_vm2, %v1032_v16 }
 0x2d4   : > { %1527 = vrot.lane.b32.xlu0 %v2685_v45, %s2038_s18  ;;  %1529 = vrot.lane.b32.xlu1 %v2697_v58, %s2038_s18 }
 0x2d6   : > { %v1034_v50 = vpop.permute.xlu1 %1033  ;;  %v1004_v53 = vpop.permute.xlu0 %1003 }
 0x2d7   : > { %1103 = vst.msk [vmem:[%s2291_s13 + $0xd8] sm:$0xff] %vm1075_vm2, %v1034_v50  ;;  %1088 = vst.msk [vmem:[%s2291_s13 + $0x60] sm:$0xff] %vm1075_vm2, %v1004_v53 }
 0x2d8   : > { %1531 = vrot.lane.b32.xlu0 %v2709_v60, %s2038_s18  ;;  %1533 = vrot.lane.b32.xlu1 %v2721_v2, %s2038_s18 }
 0x2da   : > { %v1038_v17 = vpop.permute.xlu1 %1037  ;;  %v1036_v18 = vpop.permute.xlu0 %1035 }
 0x2db   : > { %1105 = vst.msk [vmem:[%s2291_s13 + $0xe8] sm:$0xff] %vm1075_vm2, %v1038_v17  ;;  %1104 = vst.msk [vmem:[%s2291_s13 + $0xe0] sm:$0xff] %vm1075_vm2, %v1036_v18 }
 0x2dc   : > { %1535 = vrot.lane.b32.xlu0 %v2733_v47, %s2038_s18  ;;  %1537 = vrot.lane.b32.xlu1 %v2745_v7, %s2038_s18 }
 0x2de   : > { %v1010_v19 = vpop.permute.xlu1 %1009  ;;  %v1008_v20 = vpop.permute.xlu0 %1007 }
 0x2df   : > { %1091 = vst.msk [vmem:[%s2291_s13 + $0x78] sm:$0xff] %vm1075_vm2, %v1010_v19  ;;  %1090 = vst.msk [vmem:[%s2291_s13 + $0x70] sm:$0xff] %vm1075_vm2, %v1008_v20 }
 0x2e0   : > { %1539 = vrot.lane.b32.xlu0 %v2757_v9, %s2038_s18  ;;  %1541 = vrot.lane.b32.xlu1 %v2771_v11, %s2038_s18 }
 0x2e2   : > { %v1042_v62 = vpop.permute.xlu1 %1041  ;;  %v1040_v22 = vpop.permute.xlu0 %1039 }
 0x2e3   : > { %1107 = vst.msk [vmem:[%s2291_s13 + $0xf8] sm:$0xff] %vm1075_vm2, %v1042_v62  ;;  %1106 = vst.msk [vmem:[%s2291_s13 + $0xf0] sm:$0xff] %vm1075_vm2, %v1040_v22 }
 0x2e4   : > { %1543 = vrot.lane.b32.xlu0 %v2785_v21, %s2038_s18  ;;  %1545 = vrot.lane.b32.xlu1 %v2799_v25, %s2038_s18 }
 0x2e6   : > { %v1240_v56 = vpop.permute.xlu1 %1239  ;;  %v1238_v45 = vpop.permute.xlu0 %1237 }
 0x2e7   : > { %1335 = vst.msk [vmem:[%s2291_s13 + $0x8] sm:$0xff] %vm1333_vm3, %v1240_v56  ;;  %1334 = vst.msk [vmem:[%s2291_s13] sm:$0xff] %vm1333_vm3, %v1238_v45 }
 0x2e8   : > { %1547 = vrot.lane.b32.xlu0 %v2813_v30, %s2038_s18  ;;  %1549 = vrot.lane.b32.xlu1 %v2827_v33, %s2038_s18 }
 0x2ea   : > { %v1244_v57 = vpop.permute.xlu1 %1243  ;;  %v1242_v58 = vpop.permute.xlu0 %1241 }
 0x2eb   : > { %1337 = vst.msk [vmem:[%s2291_s13 + $0x18] sm:$0xff] %vm1333_vm3, %v1244_v57  ;;  %1336 = vst.msk [vmem:[%s2291_s13 + $0x10] sm:$0xff] %vm1333_vm3, %v1242_v58 }
 0x2ec   : > { %1551 = vrot.lane.b32.xlu0 %v2841_v36, %s2038_s18  ;;  %1553 = vrot.lane.b32.xlu1 %v2855_v39, %s2038_s18 }
 0x2ee   : > { %v1248_v59 = vpop.permute.xlu1 %1247  ;;  %v1246_v60 = vpop.permute.xlu0 %1245 }
 0x2ef   : > { %1339 = vst.msk [vmem:[%s2291_s13 + $0x28] sm:$0xff] %vm1333_vm3, %v1248_v59  ;;  %1338 = vst.msk [vmem:[%s2291_s13 + $0x20] sm:$0xff] %vm1333_vm3, %v1246_v60 }
 0x2f0   : > { %1555 = vrot.lane.b32.xlu0 %v2869_v41, %s2038_s18  ;;  %1557 = vrot.lane.b32.xlu1 %v2883_v51, %s2038_s18 }
 0x2f2   : > { %v1252_v61 = vpop.permute.xlu1 %1251  ;;  %v1250_v2 = vpop.permute.xlu0 %1249 }
 0x2f3   : > { %1341 = vst.msk [vmem:[%s2291_s13 + $0x38] sm:$0xff] %vm1333_vm3, %v1252_v61  ;;  %1340 = vst.msk [vmem:[%s2291_s13 + $0x30] sm:$0xff] %vm1333_vm3, %v1250_v2 }
 0x2f6   : > { %v1256_v5 = vpop.permute.xlu1 %1255  ;;  %v1254_v47 = vpop.permute.xlu0 %1253 }
 0x2f7   : > { %1343 = vst.msk [vmem:[%s2291_s13 + $0x48] sm:$0xff] %vm1333_vm3, %v1256_v5  ;;  %1342 = vst.msk [vmem:[%s2291_s13 + $0x40] sm:$0xff] %vm1333_vm3, %v1254_v47 }
 0x2fa   : > { %v1260_v6 = vpop.permute.xlu1 %1259  ;;  %v1258_v7 = vpop.permute.xlu0 %1257 }
 0x2fb   : > { %1345 = vst.msk [vmem:[%s2291_s13 + $0x58] sm:$0xff] %vm1333_vm3, %v1260_v6  ;;  %1344 = vst.msk [vmem:[%s2291_s13 + $0x50] sm:$0xff] %vm1333_vm3, %v1258_v7 }
 0x2fe   : > { %v1264_v8 = vpop.permute.xlu1 %1263  ;;  %v1262_v9 = vpop.permute.xlu0 %1261 }
 0x2ff   : > { %1347 = vst.msk [vmem:[%s2291_s13 + $0x68] sm:$0xff] %vm1333_vm3, %v1264_v8  ;;  %1346 = vst.msk [vmem:[%s2291_s13 + $0x60] sm:$0xff] %vm1333_vm3, %v1262_v9 }
 0x302   : > { %v1268_v10 = vpop.permute.xlu1 %1267  ;;  %v1266_v11 = vpop.permute.xlu0 %1265 }
 0x303   : > { %1349 = vst.msk [vmem:[%s2291_s13 + $0x78] sm:$0xff] %vm1333_vm3, %v1268_v10  ;;  %1348 = vst.msk [vmem:[%s2291_s13 + $0x70] sm:$0xff] %vm1333_vm3, %v1266_v11 }
 0x306   : > { %v1272_v40 = vpop.permute.xlu1 %1271  ;;  %v1270_v21 = vpop.permute.xlu0 %1269 }
 0x307   : > { %1351 = vst.msk [vmem:[%s2291_s13 + $0x88] sm:$0xff] %vm1333_vm3, %v1272_v40  ;;  %1350 = vst.msk [vmem:[%s2291_s13 + $0x80] sm:$0xff] %vm1333_vm3, %v1270_v21 }
 0x30a   : > { %v1276_v23 = vpop.permute.xlu1 %1275  ;;  %v1274_v25 = vpop.permute.xlu0 %1273 }
 0x30b   : > { %1353 = vst.msk [vmem:[%s2291_s13 + $0x98] sm:$0xff] %vm1333_vm3, %v1276_v23  ;;  %1352 = vst.msk [vmem:[%s2291_s13 + $0x90] sm:$0xff] %vm1333_vm3, %v1274_v25 }
 0x30e   : > { %v1280_v27 = vpop.permute.xlu1 %1279  ;;  %v1278_v30 = vpop.permute.xlu0 %1277 }
 0x30f   : > { %1355 = vst.msk [vmem:[%s2291_s13 + $0xa8] sm:$0xff] %vm1333_vm3, %v1280_v27  ;;  %1354 = vst.msk [vmem:[%s2291_s13 + $0xa0] sm:$0xff] %vm1333_vm3, %v1278_v30 }
 0x312   : > { %v1284_v32 = vpop.permute.xlu1 %1283  ;;  %v1282_v33 = vpop.permute.xlu0 %1281 }
 0x313   : > { %1357 = vst.msk [vmem:[%s2291_s13 + $0xb8] sm:$0xff] %vm1333_vm3, %v1284_v32  ;;  %1356 = vst.msk [vmem:[%s2291_s13 + $0xb0] sm:$0xff] %vm1333_vm3, %v1282_v33 }
 0x316   : > { %v1288_v35 = vpop.permute.xlu1 %1287  ;;  %v1286_v36 = vpop.permute.xlu0 %1285 }
 0x317   : > { %1359 = vst.msk [vmem:[%s2291_s13 + $0xc8] sm:$0xff] %vm1333_vm3, %v1288_v35  ;;  %1358 = vst.msk [vmem:[%s2291_s13 + $0xc0] sm:$0xff] %vm1333_vm3, %v1286_v36 }
 0x31a   : > { %v1292_v37 = vpop.permute.xlu1 %1291  ;;  %v1290_v39 = vpop.permute.xlu0 %1289 }
 0x31b   : > { %1361 = vst.msk [vmem:[%s2291_s13 + $0xd8] sm:$0xff] %vm1333_vm3, %v1292_v37  ;;  %1360 = vst.msk [vmem:[%s2291_s13 + $0xd0] sm:$0xff] %vm1333_vm3, %v1290_v39 }
 0x31e   : > { %v1296_v43 = vpop.permute.xlu1 %1295  ;;  %v1294_v41 = vpop.permute.xlu0 %1293 }
 0x31f   : > { %1363 = vst.msk [vmem:[%s2291_s13 + $0xe8] sm:$0xff] %vm1333_vm3, %v1296_v43  ;;  %1362 = vst.msk [vmem:[%s2291_s13 + $0xe0] sm:$0xff] %vm1333_vm3, %v1294_v41 }
 0x322   : > { %v1300_v46 = vpop.permute.xlu1 %1299  ;;  %v1298_v51 = vpop.permute.xlu0 %1297 }
 0x323   : > { %1365 = vst.msk [vmem:[%s2291_s13 + $0xf8] sm:$0xff] %vm1333_vm3, %v1300_v46  ;;  %1364 = vst.msk [vmem:[%s2291_s13 + $0xf0] sm:$0xff] %vm1333_vm3, %v1298_v51 }
 0x326   : > { %v1498_v24 = vpop.permute.xlu1 %1497  ;;  %v1496_v26 = vpop.permute.xlu0 %1495 }
 0x327   : > { %1593 = vst.msk [vmem:[%s2291_s13 + $0x8] sm:$0xff] %vm1591_vm4, %v1498_v24  ;;  %1592 = vst.msk [vmem:[%s2291_s13] sm:$0xff] %vm1591_vm4, %v1496_v26 }
 0x32a   : > { %v1502_v29 = vpop.permute.xlu1 %1501  ;;  %v1500_v31 = vpop.permute.xlu0 %1499 }
 0x32b   : > { %1595 = vst.msk [vmem:[%s2291_s13 + $0x18] sm:$0xff] %vm1591_vm4, %v1502_v29  ;;  %1594 = vst.msk [vmem:[%s2291_s13 + $0x10] sm:$0xff] %vm1591_vm4, %v1500_v31 }
 0x32e   : > { %v1506_v63 = vpop.permute.xlu1 %1505  ;;  %v1504_v34 = vpop.permute.xlu0 %1503 }
 0x32f   : > { %1597 = vst.msk [vmem:[%s2291_s13 + $0x28] sm:$0xff] %vm1591_vm4, %v1506_v63  ;;  %1596 = vst.msk [vmem:[%s2291_s13 + $0x20] sm:$0xff] %vm1591_vm4, %v1504_v34 }
 0x332   : > { %v1510_v28 = vpop.permute.xlu1 %1509  ;;  %v1508_v0 = vpop.permute.xlu0 %1507 }
 0x333   : > { %1599 = vst.msk [vmem:[%s2291_s13 + $0x38] sm:$0xff] %vm1591_vm4, %v1510_v28  ;;  %1598 = vst.msk [vmem:[%s2291_s13 + $0x30] sm:$0xff] %vm1591_vm4, %v1508_v0 }
 0x336   : > { %v1514_v38 = vpop.permute.xlu1 %1513  ;;  %v1512_v42 = vpop.permute.xlu0 %1511 }
 0x337   : > { %1601 = vst.msk [vmem:[%s2291_s13 + $0x48] sm:$0xff] %vm1591_vm4, %v1514_v38  ;;  %1600 = vst.msk [vmem:[%s2291_s13 + $0x40] sm:$0xff] %vm1591_vm4, %v1512_v42 }
 0x33a   : > { %v1518_v1 = vpop.permute.xlu1 %1517  ;;  %v1516_v44 = vpop.permute.xlu0 %1515 }
 0x33b   : > { %1603 = vst.msk [vmem:[%s2291_s13 + $0x58] sm:$0xff] %vm1591_vm4, %v1518_v1  ;;  %1602 = vst.msk [vmem:[%s2291_s13 + $0x50] sm:$0xff] %vm1591_vm4, %v1516_v44 }
 0x33e   : > { %v1522_v49 = vpop.permute.xlu1 %1521  ;;  %v1520_v3 = vpop.permute.xlu0 %1519 }
 0x33f   : > { %1605 = vst.msk [vmem:[%s2291_s13 + $0x68] sm:$0xff] %vm1591_vm4, %v1522_v49  ;;  %1604 = vst.msk [vmem:[%s2291_s13 + $0x60] sm:$0xff] %vm1591_vm4, %v1520_v3 }
 0x342   : > { %v1526_v54 = vpop.permute.xlu1 %1525  ;;  %v1524_v55 = vpop.permute.xlu0 %1523 }
 0x343   : > { %1607 = vst.msk [vmem:[%s2291_s13 + $0x78] sm:$0xff] %vm1591_vm4, %v1526_v54  ;;  %1606 = vst.msk [vmem:[%s2291_s13 + $0x70] sm:$0xff] %vm1591_vm4, %v1524_v55 }
 0x346   : > { %v1530_v4 = vpop.permute.xlu1 %1529  ;;  %v1528_v48 = vpop.permute.xlu0 %1527 }
 0x347   : > { %1609 = vst.msk [vmem:[%s2291_s13 + $0x88] sm:$0xff] %vm1591_vm4, %v1530_v4  ;;  %1608 = vst.msk [vmem:[%s2291_s13 + $0x80] sm:$0xff] %vm1591_vm4, %v1528_v48 }
 0x34a   : > { %v1534_v52 = vpop.permute.xlu1 %1533  ;;  %v1532_v12 = vpop.permute.xlu0 %1531 }
 0x34b   : > { %1611 = vst.msk [vmem:[%s2291_s13 + $0x98] sm:$0xff] %vm1591_vm4, %v1534_v52  ;;  %1610 = vst.msk [vmem:[%s2291_s13 + $0x90] sm:$0xff] %vm1591_vm4, %v1532_v12 }
 0x34e   : > { %v1538_v13 = vpop.permute.xlu1 %1537  ;;  %v1536_v14 = vpop.permute.xlu0 %1535 }
 0x34f   : > { %1613 = vst.msk [vmem:[%s2291_s13 + $0xa8] sm:$0xff] %vm1591_vm4, %v1538_v13  ;;  %1612 = vst.msk [vmem:[%s2291_s13 + $0xa0] sm:$0xff] %vm1591_vm4, %v1536_v14 }
 0x352   : > { %v1542_v15 = vpop.permute.xlu1 %1541  ;;  %v1540_v16 = vpop.permute.xlu0 %1539 }
 0x353   : > { %1615 = vst.msk [vmem:[%s2291_s13 + $0xb8] sm:$0xff] %vm1591_vm4, %v1542_v15  ;;  %1614 = vst.msk [vmem:[%s2291_s13 + $0xb0] sm:$0xff] %vm1591_vm4, %v1540_v16 }
 0x356   : > { %v1546_v50 = vpop.permute.xlu1 %1545  ;;  %v1544_v53 = vpop.permute.xlu0 %1543 }
 0x357   : > { %1617 = vst.msk [vmem:[%s2291_s13 + $0xc8] sm:$0xff] %vm1591_vm4, %v1546_v50  ;;  %1616 = vst.msk [vmem:[%s2291_s13 + $0xc0] sm:$0xff] %vm1591_vm4, %v1544_v53 }
 0x35a   : > { %v1550_v17 = vpop.permute.xlu1 %1549  ;;  %v1548_v18 = vpop.permute.xlu0 %1547 }
 0x35b   : > { %1619 = vst.msk [vmem:[%s2291_s13 + $0xd8] sm:$0xff] %vm1591_vm4, %v1550_v17  ;;  %1618 = vst.msk [vmem:[%s2291_s13 + $0xd0] sm:$0xff] %vm1591_vm4, %v1548_v18 }
 0x35e   : > { %v1554_v19 = vpop.permute.xlu1 %1553  ;;  %v1552_v20 = vpop.permute.xlu0 %1551 }
 0x35f   : > { %1621 = vst.msk [vmem:[%s2291_s13 + $0xe8] sm:$0xff] %vm1591_vm4, %v1554_v19  ;;  %1620 = vst.msk [vmem:[%s2291_s13 + $0xe0] sm:$0xff] %vm1591_vm4, %v1552_v20 }
 0x362   : > { %v1558_v62 = vpop.permute.xlu1 %1557  ;;  %v1556_v22 = vpop.permute.xlu0 %1555 }
 0x363   : > { %1623 = vst.msk [vmem:[%s2291_s13 + $0xf8] sm:$0xff] %vm1591_vm4, %v1558_v62  ;;  %1622 = vst.msk [vmem:[%s2291_s13 + $0xf0] sm:$0xff] %vm1591_vm4, %v1556_v22 }
 0x364 PF: > { %s17_s23 = sadd.s32 1, %s2033_s23   ;;  %s3188_s21 = smov %s2029_s22 }
 0x365   : > { %p14_p5 = scmp.ge.s32.totalorder %s17_s23, 4   ;;  %s3189_s22 = smov %s3191_s24 }
 0x367   :  { %16 = sbr.rel (!%p14_p5) target bundleno = 2 (0x2), region = 89 }

</bundles_post_ra>
